<compile_context>
chip_gen: v7x
topology: tpu7x:2x2x1
jax: 0.10.0
libtpu: 0.0.40
codegen_flags: <defaults>
</compile_context>

<pallas_src>
import functools

import jax
import jax.numpy as jnp
from jax.experimental import pallas as pl
from jax.experimental.pallas import tpu as pltpu

INPUT_SIZE = 2
HIDDEN_SIZE = 64
OUTPUT_SIZE = 1

VMEM_LIMIT = 32 * 1024 * 1024  # >= default on v6e/v7x, > v5e's 16 MiB default


# ----------------------------------------------------------------------------
# Kernels
# ----------------------------------------------------------------------------
def _encoder_kernel(x_ref, w1_ref, b1_ref, w2_ref, b2_ref, h_ref):
    """(tile, 2) -> Linear(2,64) -> ReLU -> Linear(64,64), output bf16."""
    x = x_ref[...]                                   # (tile, 2) f32
    # K=2 matmul done on the VPU as two broadcast multiply-adds (MXU would run
    # at a few % utilization for K=2).
    h1 = (x[:, 0:1] * w1_ref[0:1, :]
          + x[:, 1:2] * w1_ref[1:2, :]) + b1_ref[...]
    h1 = jnp.maximum(h1, 0.0)
    h2 = jnp.dot(h1.astype(jnp.bfloat16), w2_ref[...],
                 preferred_element_type=jnp.float32) + b2_ref[...]
    h_ref[...] = h2.astype(h_ref.dtype)


def _gcn_layer_kernel(a_ref, h_ref, w_ref, b_ref, out_ref, acc_ref):
    """One GCNConv layer: out_row_tile = (sum_k A[i,k] @ h[k]) @ W + b."""
    k = pl.program_id(1)

    @pl.when(k == 0)
    def _():
        acc_ref[...] = jnp.zeros_like(acc_ref)

    # bf16 x bf16 -> f32 accumulate on the MXU.
    acc_ref[...] += jnp.dot(a_ref[...], h_ref[...],
                            preferred_element_type=jnp.float32)

    @pl.when(k == pl.num_programs(1) - 1)
    def _():
        agg = acc_ref[...].astype(jnp.bfloat16)
        out = jnp.dot(agg, w_ref[...],
                      preferred_element_type=jnp.float32) + b_ref[...]
        out_ref[...] = out.astype(out_ref.dtype)


def _decoder_kernel(h_ref, w1_ref, b1_ref, w2_ref, b2_ref, out_ref):
    """(tile, 64) -> Linear(64,64) -> ReLU -> Linear(64,1) -> sigmoid."""
    d = jnp.dot(h_ref[...], w1_ref[...],
                preferred_element_type=jnp.float32) + b1_ref[...]
    d = jnp.maximum(d, 0.0)
    # 64 -> 1 projection as a VPU multiply + cross-lane (XLU) reduction.
    o = jnp.sum(d * w2_ref[...], axis=-1, keepdims=True) + b2_ref[...]
    out_ref[...] = jax.nn.sigmoid(o)


# ----------------------------------------------------------------------------
# pallas_call wrappers (grids + BlockSpecs)
# ----------------------------------------------------------------------------
def _run_encoder(x_pad, w1, b1, w2, b2, *, tile, n_pad):
    grid = (n_pad // tile,)
    return pl.pallas_call(
        _encoder_kernel,
        out_shape=jax.ShapeDtypeStruct((n_pad, HIDDEN_SIZE), jnp.bfloat16),
        grid_spec=pltpu.PrefetchScalarGridSpec(
            num_scalar_prefetch=0, grid=grid,
            in_specs=[
                pl.BlockSpec((tile, INPUT_SIZE), lambda i: (i, 0)),
                pl.BlockSpec((INPUT_SIZE, HIDDEN_SIZE), lambda i: (0, 0)),
                pl.BlockSpec((1, HIDDEN_SIZE), lambda i: (0, 0)),
                pl.BlockSpec((HIDDEN_SIZE, HIDDEN_SIZE), lambda i: (0, 0)),
                pl.BlockSpec((1, HIDDEN_SIZE), lambda i: (0, 0)),
            ],
            out_specs=pl.BlockSpec((tile, HIDDEN_SIZE), lambda i: (i, 0)),
        ),
        compiler_params=pltpu.CompilerParams(
            dimension_semantics=("parallel",),
            vmem_limit_bytes=VMEM_LIMIT),
    )(x_pad, w1, b1, w2, b2)


def _run_gcn_layer(a, h, w, b, *, tile, n_pad):
    grid = (n_pad // tile, n_pad // tile)   # (row tiles, reduction tiles)
    return pl.pallas_call(
        _gcn_layer_kernel,
        out_shape=jax.ShapeDtypeStruct((n_pad, HIDDEN_SIZE), jnp.bfloat16),
        grid_spec=pltpu.PrefetchScalarGridSpec(
            num_scalar_prefetch=0, grid=grid,
            in_specs=[
                pl.BlockSpec((tile, tile), lambda i, k: (i, k)),            # A
                pl.BlockSpec((tile, HIDDEN_SIZE), lambda i, k: (k, 0)),     # h
                pl.BlockSpec((HIDDEN_SIZE, HIDDEN_SIZE), lambda i, k: (0, 0)),
                pl.BlockSpec((1, HIDDEN_SIZE), lambda i, k: (0, 0)),
            ],
            out_specs=pl.BlockSpec((tile, HIDDEN_SIZE), lambda i, k: (i, 0)),
            scratch_shapes=[pltpu.VMEM((tile, HIDDEN_SIZE), jnp.float32)],
        ),
        compiler_params=pltpu.CompilerParams(
            dimension_semantics=("parallel", "arbitrary"),
            vmem_limit_bytes=VMEM_LIMIT),
    )(a, h, w, b)


def _run_decoder(h, w1, b1, w2_row, b2, *, tile, n_pad):
    grid = (n_pad // tile,)
    return pl.pallas_call(
        _decoder_kernel,
        out_shape=jax.ShapeDtypeStruct((n_pad, OUTPUT_SIZE), jnp.float32),
        grid_spec=pltpu.PrefetchScalarGridSpec(
            num_scalar_prefetch=0, grid=grid,
            in_specs=[
                pl.BlockSpec((tile, HIDDEN_SIZE), lambda i: (i, 0)),
                pl.BlockSpec((HIDDEN_SIZE, HIDDEN_SIZE), lambda i: (0, 0)),
                pl.BlockSpec((1, HIDDEN_SIZE), lambda i: (0, 0)),
                pl.BlockSpec((1, HIDDEN_SIZE), lambda i: (0, 0)),
                pl.BlockSpec((1, OUTPUT_SIZE), lambda i: (0, 0)),
            ],
            out_specs=pl.BlockSpec((tile, OUTPUT_SIZE), lambda i: (i, 0)),
        ),
        compiler_params=pltpu.CompilerParams(
            dimension_semantics=("parallel",),
            vmem_limit_bytes=VMEM_LIMIT),
    )(h, w1, b1, w2_row, b2)


# ----------------------------------------------------------------------------
# Glue: dense symmetric-normalized adjacency (torch_geometric GCNConv gcn_norm)
# ----------------------------------------------------------------------------
def gcn_norm_dense(edge_index, edge_weight, num_nodes, n_pad):
    row = edge_index[0]            # source
    col = edge_index[1]            # target (aggregation happens at target)
    loop = jnp.arange(num_nodes, dtype=edge_index.dtype)
    row = jnp.concatenate([row, loop])
    col = jnp.concatenate([col, loop])
    w = jnp.concatenate(
        [edge_weight, jnp.ones((num_nodes,), edge_weight.dtype)])
    deg = jnp.zeros((num_nodes,), w.dtype).at[col].add(w)
    dinv = jnp.where(deg > 0, 1.0 / jnp.sqrt(deg), 0.0)
    norm = dinv[row] * w * dinv[col]
    # out[col] += norm * x[row]  ==>  A[col, row] = norm   (padded rows/cols = 0)
    a = jnp.zeros((n_pad, n_pad), w.dtype).at[col, row].add(norm)
    return a


# ----------------------------------------------------------------------------
# Parameter init (deterministic, PyTorch-Linear-style uniform(-1/sqrt(fan_in)))
# ----------------------------------------------------------------------------
def _linear_params(key, fan_in, fan_out):
    kw, kb = jax.random.split(key)
    bound = 1.0 / jnp.sqrt(jnp.float32(fan_in))
    w = jax.random.uniform(kw, (fan_in, fan_out), jnp.float32, -bound, bound)
    b = jax.random.uniform(kb, (1, fan_out), jnp.float32, -bound, bound)
    return w, b


def init_params(key, num_mp_layers):
    keys = jax.random.split(key, 4 + num_mp_layers)
    ew1, eb1 = _linear_params(keys[0], INPUT_SIZE, HIDDEN_SIZE)
    ew2, eb2 = _linear_params(keys[1], HIDDEN_SIZE, HIDDEN_SIZE)
    pws, pbs = [], []
    for l in range(num_mp_layers):
        w, b = _linear_params(keys[2 + l], HIDDEN_SIZE, HIDDEN_SIZE)
        pws.append(w)
        pbs.append(b)
    pw = jnp.stack(pws)                         # (L, 64, 64)
    pb = jnp.stack(pbs)                         # (L, 1, 64)
    dw1, db1 = _linear_params(keys[2 + num_mp_layers], HIDDEN_SIZE, HIDDEN_SIZE)
    dw2, db2 = _linear_params(keys[3 + num_mp_layers], HIDDEN_SIZE, OUTPUT_SIZE)
    return dict(ew1=ew1, eb1=eb1, ew2=ew2, eb2=eb2, pw=pw, pb=pb,
                dw1=dw1, db1=db1, dw2=dw2, db2=db2)


# ----------------------------------------------------------------------------
# Forward wrapper
# ----------------------------------------------------------------------------
@functools.partial(jax.jit, static_argnames=("num_mp_layers", "tile"))
def fillsimnet_forward(params, x, edge_index, edge_weight, num_mp_layers,
                       tile=128):
    n = x.shape[0]
    n_pad = ((n + tile - 1) // tile) * tile

    # Densified, padded adjacency in bf16 (MXU operand; halves VMEM/HBM bytes).
    a = gcn_norm_dense(edge_index, edge_weight, n, n_pad).astype(jnp.bfloat16)
    x_pad = jnp.zeros((n_pad, INPUT_SIZE), jnp.float32).at[:n].set(x)

    # Encoder: (n_pad, 2) -> (n_pad, 64) bf16
    h = _run_encoder(x_pad,
                     params["ew1"], params["eb1"],
                     params["ew2"].astype(jnp.bfloat16), params["eb2"],
                     tile=tile, n_pad=n_pad)

    # Processor: num_mp_layers x GCNConv (no nonlinearity in GCNConv)
    for l in range(num_mp_layers):
        h = _run_gcn_layer(a, h,
                           params["pw"][l].astype(jnp.bfloat16),
                           params["pb"][l],
                           tile=tile, n_pad=n_pad)

    # Decoder: (n_pad, 64) -> (n_pad, 1), sigmoid
    out = _run_decoder(h,
                       params["dw1"].astype(jnp.bfloat16), params["db1"],
                       params["dw2"].T, params["db2"],
                       tile=tile, n_pad=n_pad)
    return out[:n]


# ----------------------------------------------------------------------------
# Pure-JAX f32 reference (for correctness check)
# ----------------------------------------------------------------------------
def fillsimnet_ref(params, x, edge_index, edge_weight, num_mp_layers):
    n = x.shape[0]
    a = gcn_norm_dense(edge_index, edge_weight, n, n)
    h = jnp.maximum(x @ params["ew1"] + params["eb1"], 0.0)
    h = h @ params["ew2"] + params["eb2"]
    for l in range(num_mp_layers):
        h = a @ (h @ params["pw"][l]) + params["pb"][l]
    d = jnp.maximum(h @ params["dw1"] + params["db1"], 0.0)
    d = d @ params["dw2"] + params["db2"]
    return jax.nn.sigmoid(d)


if __name__ == "__main__":
    NUM_MP_LAYERS = 3
    N_NODES = 200      # pads to 256 -> 2x2 grid of 128-tiles (exercises pipeline)
    N_EDGES = 800

    key = jax.random.PRNGKey(0)
    k_param, k_x, k_src, k_dst, k_w = jax.random.split(key, 5)

    params = init_params(k_param, NUM_MP_LAYERS)

    x = jax.random.normal(k_x, (N_NODES, INPUT_SIZE), jnp.float32)
    src = jax.random.randint(k_src, (N_EDGES,), 0, N_NODES, jnp.int32)
    dst = jax.random.randint(k_dst, (N_EDGES,), 0, N_NODES, jnp.int32)
    edge_index = jnp.stack([src, dst])                       # (2, E)
    edge_weight = jax.random.uniform(k_w, (N_EDGES,), jnp.float32, 0.1, 1.0)

    out = fillsimnet_forward(params, x, edge_index, edge_weight, NUM_MP_LAYERS)
    out = jax.block_until_ready(out)

    ref = fillsimnet_ref(params, x, edge_index, edge_weight, NUM_MP_LAYERS)
    assert out.shape == (N_NODES, OUTPUT_SIZE)
    # bf16 MXU operands vs f32 reference -> relaxed tolerance (post-sigmoid).
    assert jnp.allclose(out, ref, atol=2e-2, rtol=0.0), (
        float(jnp.max(jnp.abs(out - ref))))

    print("KERNEL_OK")
</pallas_src>

<mosaic_0001>
module attributes {stable_mosaic.version = 11 : i64} {
  func.func @_encoder_kernel(%arg0: i32, %arg1: memref<128x2xf32, #tpu.memory_space<vmem>>, %arg2: memref<2x64xf32, #tpu.memory_space<vmem>>, %arg3: memref<1x64xf32, #tpu.memory_space<vmem>>, %arg4: memref<64x64xbf16, #tpu.memory_space<vmem>>, %arg5: memref<1x64xf32, #tpu.memory_space<vmem>>, %arg6: memref<128x64xbf16, #tpu.memory_space<vmem>>) attributes {dimension_semantics = [#tpu.dimension_semantics<parallel>], iteration_bounds = array<i64: 2>, scalar_prefetch = 0 : i64, scratch_operands = 0 : i64, tpu.core_type = #tpu.core_type<tc>, window_params = [{transform_indices = @transform_0, window_bounds = array<i64: 128, 2>}, {pipeline_mode = #tpu.pipeline_mode<synchronous>, transform_indices = @transform_1, window_bounds = array<i64: 2, 64>}, {pipeline_mode = #tpu.pipeline_mode<synchronous>, transform_indices = @transform_2, window_bounds = array<i64: 1, 64>}, {pipeline_mode = #tpu.pipeline_mode<synchronous>, transform_indices = @transform_3, window_bounds = array<i64: 64, 64>}, {pipeline_mode = #tpu.pipeline_mode<synchronous>, transform_indices = @transform_4, window_bounds = array<i64: 1, 64>}, {transform_indices = @transform_5, window_bounds = array<i64: 128, 64>}]} {
    %c0 = arith.constant 0 : index
    %c0_0 = arith.constant 0 : index
    %0 = vector.load %arg1[%c0, %c0_0] : memref<128x2xf32, #tpu.memory_space<vmem>>, vector<128x2xf32>
    %1 = vector.extract_strided_slice %0 {offsets = [0, 0], sizes = [128, 1], strides = [1, 1]} : vector<128x2xf32> to vector<128x1xf32>
    %c0_1 = arith.constant 0 : index
    %c0_2 = arith.constant 0 : index
    %2 = vector.load %arg2[%c0_1, %c0_2] : memref<2x64xf32, #tpu.memory_space<vmem>>, vector<1x64xf32>
    %3 = vector.broadcast %1 : vector<128x1xf32> to vector<128x64xf32>
    %4 = vector.broadcast %2 : vector<1x64xf32> to vector<128x64xf32>
    %5 = arith.mulf %3, %4 : vector<128x64xf32>
    %6 = vector.extract_strided_slice %0 {offsets = [0, 1], sizes = [128, 1], strides = [1, 1]} : vector<128x2xf32> to vector<128x1xf32>
    %c1 = arith.constant 1 : index
    %c0_3 = arith.constant 0 : index
    %7 = vector.load %arg2[%c1, %c0_3] : memref<2x64xf32, #tpu.memory_space<vmem>>, vector<1x64xf32>
    %8 = vector.broadcast %6 : vector<128x1xf32> to vector<128x64xf32>
    %9 = vector.broadcast %7 : vector<1x64xf32> to vector<128x64xf32>
    %10 = arith.mulf %8, %9 : vector<128x64xf32>
    %11 = arith.addf %5, %10 : vector<128x64xf32>
    %c0_4 = arith.constant 0 : index
    %c0_5 = arith.constant 0 : index
    %12 = vector.load %arg3[%c0_4, %c0_5] : memref<1x64xf32, #tpu.memory_space<vmem>>, vector<1x64xf32>
    %13 = vector.broadcast %12 : vector<1x64xf32> to vector<128x64xf32>
    %14 = arith.addf %11, %13 : vector<128x64xf32>
    %cst = arith.constant 0.000000e+00 : f32
    %15 = vector.broadcast %cst : f32 to vector<128x64xf32>
    %16 = arith.maximumf %14, %15 : vector<128x64xf32>
    %17 = arith.truncf %16 : vector<128x64xf32> to vector<128x64xbf16>
    %c0_6 = arith.constant 0 : index
    %c0_7 = arith.constant 0 : index
    %18 = vector.load %arg4[%c0_6, %c0_7] : memref<64x64xbf16, #tpu.memory_space<vmem>>, vector<64x64xbf16>
    %cst_8 = arith.constant dense<0.000000e+00> : vector<128x64xf32>
    %19 = tpu.matmul %17, %18, %cst_8 {dimension_numbers = #tpu.dot_dimension_numbers<[1], [0], [0], [1], [0, 0, 1, 1], [], []>} : vector<128x64xbf16>, vector<64x64xbf16>, vector<128x64xf32> -> vector<128x64xf32>
    %c0_9 = arith.constant 0 : index
    %c0_10 = arith.constant 0 : index
    %20 = vector.load %arg5[%c0_9, %c0_10] : memref<1x64xf32, #tpu.memory_space<vmem>>, vector<1x64xf32>
    %21 = vector.broadcast %20 : vector<1x64xf32> to vector<128x64xf32>
    %22 = arith.addf %19, %21 : vector<128x64xf32>
    %23 = arith.truncf %22 : vector<128x64xf32> to vector<128x64xbf16>
    %c0_11 = arith.constant 0 : index
    %c0_12 = arith.constant 0 : index
    %24 = vector.load %arg6[%c0_11, %c0_12] : memref<128x64xbf16, #tpu.memory_space<vmem>>, vector<128x64xbf16>
    tpu.vector_store %arg6[%c0_11, %c0_12], %23 {strides = array<i32>} : memref<128x64xbf16, #tpu.memory_space<vmem>>, vector<128x64xbf16>,
    return
  }
  func.func @transform_0(%arg0: i32) -> (i32, i32) {
    %c0_i32 = arith.constant 0 : i32
    %c0_i32_0 = arith.constant 0 : i32
    return %arg0, %c0_i32 : i32, i32
  }
  func.func @transform_1(%arg0: i32) -> (i32, i32) {
    %c0_i32 = arith.constant 0 : i32
    %c0_i32_0 = arith.constant 0 : i32
    %c0_i32_1 = arith.constant 0 : i32
    return %c0_i32, %c0_i32_0 : i32, i32
  }
  func.func @transform_2(%arg0: i32) -> (i32, i32) {
    %c0_i32 = arith.constant 0 : i32
    %c0_i32_0 = arith.constant 0 : i32
    %c0_i32_1 = arith.constant 0 : i32
    return %c0_i32, %c0_i32_0 : i32, i32
  }
  func.func @transform_3(%arg0: i32) -> (i32, i32) {
    %c0_i32 = arith.constant 0 : i32
    %c0_i32_0 = arith.constant 0 : i32
    %c0_i32_1 = arith.constant 0 : i32
    return %c0_i32, %c0_i32_0 : i32, i32
  }
  func.func @transform_4(%arg0: i32) -> (i32, i32) {
    %c0_i32 = arith.constant 0 : i32
    %c0_i32_0 = arith.constant 0 : i32
    %c0_i32_1 = arith.constant 0 : i32
    return %c0_i32, %c0_i32_0 : i32, i32
  }
  func.func @transform_5(%arg0: i32) -> (i32, i32) {
    %c0_i32 = arith.constant 0 : i32
    %c0_i32_0 = arith.constant 0 : i32
    return %arg0, %c0_i32 : i32, i32
  }
}

module attributes {stable_mosaic.version = 11 : i64} {
  func.func @_gcn_layer_kernel(%arg0: i32, %arg1: i32, %arg2: memref<128x128xbf16, #tpu.memory_space<vmem>>, %arg3: memref<128x64xbf16, #tpu.memory_space<vmem>>, %arg4: memref<64x64xbf16, #tpu.memory_space<vmem>>, %arg5: memref<1x64xf32, #tpu.memory_space<vmem>>, %arg6: memref<128x64xbf16, #tpu.memory_space<vmem>>, %arg7: memref<128x64xf32, #tpu.memory_space<vmem>>) attributes {dimension_semantics = [#tpu.dimension_semantics<parallel>, #tpu.dimension_semantics<arbitrary>], iteration_bounds = array<i64: 2, 2>, scalar_prefetch = 0 : i64, scratch_operands = 1 : i64, tpu.core_type = #tpu.core_type<tc>, window_params = [{transform_indices = @transform_0, window_bounds = array<i64: 128, 128>}, {transform_indices = @transform_1, window_bounds = array<i64: 128, 64>}, {pipeline_mode = #tpu.pipeline_mode<synchronous>, transform_indices = @transform_2, window_bounds = array<i64: 64, 64>}, {pipeline_mode = #tpu.pipeline_mode<synchronous>, transform_indices = @transform_3, window_bounds = array<i64: 1, 64>}, {transform_indices = @transform_4, window_bounds = array<i64: 128, 64>}]} {
    %c0_i32 = arith.constant 0 : i32
    %0 = arith.cmpi eq, %arg1, %c0_i32 : i32
    %1 = arith.extui %0 : i1 to i32
    %c0_i32_0 = arith.constant 0 : i32
    %2 = arith.cmpi ne, %1, %c0_i32_0 : i32
    scf.if %2 {
      %cst_9 = arith.constant 0.000000e+00 : f32
      %12 = vector.broadcast %cst_9 : f32 to vector<128x64xf32>
      %c0_10 = arith.constant 0 : index
      %c0_11 = arith.constant 0 : index
      %13 = vector.load %arg7[%c0_10, %c0_11] : memref<128x64xf32, #tpu.memory_space<vmem>>, vector<128x64xf32>
      tpu.vector_store %arg7[%c0_10, %c0_11], %12 {strides = array<i32>} : memref<128x64xf32, #tpu.memory_space<vmem>>, vector<128x64xf32>,
    } else {
    }
    %c0 = arith.constant 0 : index
    %c0_1 = arith.constant 0 : index
    %3 = vector.load %arg7[%c0, %c0_1] : memref<128x64xf32, #tpu.memory_space<vmem>>, vector<128x64xf32>
    %c0_2 = arith.constant 0 : index
    %c0_3 = arith.constant 0 : index
    %4 = vector.load %arg2[%c0_2, %c0_3] : memref<128x128xbf16, #tpu.memory_space<vmem>>, vector<128x128xbf16>
    %c0_4 = arith.constant 0 : index
    %c0_5 = arith.constant 0 : index
    %5 = vector.load %arg3[%c0_4, %c0_5] : memref<128x64xbf16, #tpu.memory_space<vmem>>, vector<128x64xbf16>
    %cst = arith.constant dense<0.000000e+00> : vector<128x64xf32>
    %6 = tpu.matmul %4, %5, %cst {dimension_numbers = #tpu.dot_dimension_numbers<[1], [0], [0], [1], [0, 0, 1, 1], [], []>} : vector<128x128xbf16>, vector<128x64xbf16>, vector<128x64xf32> -> vector<128x64xf32>
    %7 = arith.addf %3, %6 : vector<128x64xf32>
    %c0_6 = arith.constant 0 : index
    %c0_7 = arith.constant 0 : index
    %8 = vector.load %arg7[%c0_6, %c0_7] : memref<128x64xf32, #tpu.memory_space<vmem>>, vector<128x64xf32>
    tpu.vector_store %arg7[%c0_6, %c0_7], %7 {strides = array<i32>} : memref<128x64xf32, #tpu.memory_space<vmem>>, vector<128x64xf32>,
    %c1_i32 = arith.constant 1 : i32
    %9 = arith.cmpi eq, %arg1, %c1_i32 : i32
    %10 = arith.extui %9 : i1 to i32
    %c0_i32_8 = arith.constant 0 : i32
    %11 = arith.cmpi ne, %10, %c0_i32_8 : i32
    scf.if %11 {
      %c0_9 = arith.constant 0 : index
      %c0_10 = arith.constant 0 : index
      %12 = vector.load %arg7[%c0_9, %c0_10] : memref<128x64xf32, #tpu.memory_space<vmem>>, vector<128x64xf32>
      %13 = arith.truncf %12 : vector<128x64xf32> to vector<128x64xbf16>
      %c0_11 = arith.constant 0 : index
      %c0_12 = arith.constant 0 : index
      %14 = vector.load %arg4[%c0_11, %c0_12] : memref<64x64xbf16, #tpu.memory_space<vmem>>, vector<64x64xbf16>
      %cst_13 = arith.constant dense<0.000000e+00> : vector<128x64xf32>
      %15 = tpu.matmul %13, %14, %cst_13 {dimension_numbers = #tpu.dot_dimension_numbers<[1], [0], [0], [1], [0, 0, 1, 1], [], []>} : vector<128x64xbf16>, vector<64x64xbf16>, vector<128x64xf32> -> vector<128x64xf32>
      %c0_14 = arith.constant 0 : index
      %c0_15 = arith.constant 0 : index
      %16 = vector.load %arg5[%c0_14, %c0_15] : memref<1x64xf32, #tpu.memory_space<vmem>>, vector<1x64xf32>
      %17 = vector.broadcast %16 : vector<1x64xf32> to vector<128x64xf32>
      %18 = arith.addf %15, %17 : vector<128x64xf32>
      %19 = arith.truncf %18 : vector<128x64xf32> to vector<128x64xbf16>
      %c0_16 = arith.constant 0 : index
      %c0_17 = arith.constant 0 : index
      %20 = vector.load %arg6[%c0_16, %c0_17] : memref<128x64xbf16, #tpu.memory_space<vmem>>, vector<128x64xbf16>
      tpu.vector_store %arg6[%c0_16, %c0_17], %19 {strides = array<i32>} : memref<128x64xbf16, #tpu.memory_space<vmem>>, vector<128x64xbf16>,
    } else {
    }
    return
  }
  func.func @transform_0(%arg0: i32, %arg1: i32) -> (i32, i32) {
    %c0_i32 = arith.constant 0 : i32
    return %arg0, %arg1 : i32, i32
  }
  func.func @transform_1(%arg0: i32, %arg1: i32) -> (i32, i32) {
    %c0_i32 = arith.constant 0 : i32
    %c0_i32_0 = arith.constant 0 : i32
    return %arg1, %c0_i32 : i32, i32
  }
  func.func @transform_2(%arg0: i32, %arg1: i32) -> (i32, i32) {
    %c0_i32 = arith.constant 0 : i32
    %c0_i32_0 = arith.constant 0 : i32
    %c0_i32_1 = arith.constant 0 : i32
    return %c0_i32, %c0_i32_0 : i32, i32
  }
  func.func @transform_3(%arg0: i32, %arg1: i32) -> (i32, i32) {
    %c0_i32 = arith.constant 0 : i32
    %c0_i32_0 = arith.constant 0 : i32
    %c0_i32_1 = arith.constant 0 : i32
    return %c0_i32, %c0_i32_0 : i32, i32
  }
  func.func @transform_4(%arg0: i32, %arg1: i32) -> (i32, i32) {
    %c0_i32 = arith.constant 0 : i32
    %c0_i32_0 = arith.constant 0 : i32
    return %arg0, %c0_i32 : i32, i32
  }
}

module attributes {stable_mosaic.version = 11 : i64} {
  func.func @_decoder_kernel(%arg0: i32, %arg1: memref<128x64xbf16, #tpu.memory_space<vmem>>, %arg2: memref<64x64xbf16, #tpu.memory_space<vmem>>, %arg3: memref<1x64xf32, #tpu.memory_space<vmem>>, %arg4: memref<1x64xf32, #tpu.memory_space<vmem>>, %arg5: memref<1x1xf32, #tpu.memory_space<vmem>>, %arg6: memref<128x1xf32, #tpu.memory_space<vmem>>) attributes {dimension_semantics = [#tpu.dimension_semantics<parallel>], iteration_bounds = array<i64: 2>, scalar_prefetch = 0 : i64, scratch_operands = 0 : i64, tpu.core_type = #tpu.core_type<tc>, window_params = [{transform_indices = @transform_0, window_bounds = array<i64: 128, 64>}, {pipeline_mode = #tpu.pipeline_mode<synchronous>, transform_indices = @transform_1, window_bounds = array<i64: 64, 64>}, {pipeline_mode = #tpu.pipeline_mode<synchronous>, transform_indices = @transform_2, window_bounds = array<i64: 1, 64>}, {pipeline_mode = #tpu.pipeline_mode<synchronous>, transform_indices = @transform_3, window_bounds = array<i64: 1, 64>}, {pipeline_mode = #tpu.pipeline_mode<synchronous>, transform_indices = @transform_4, window_bounds = array<i64: 1, 1>}, {transform_indices = @transform_5, window_bounds = array<i64: 128, 1>}]} {
    %c0 = arith.constant 0 : index
    %c0_0 = arith.constant 0 : index
    %0 = vector.load %arg1[%c0, %c0_0] : memref<128x64xbf16, #tpu.memory_space<vmem>>, vector<128x64xbf16>
    %c0_1 = arith.constant 0 : index
    %c0_2 = arith.constant 0 : index
    %1 = vector.load %arg2[%c0_1, %c0_2] : memref<64x64xbf16, #tpu.memory_space<vmem>>, vector<64x64xbf16>
    %cst = arith.constant dense<0.000000e+00> : vector<128x64xf32>
    %2 = tpu.matmul %0, %1, %cst {dimension_numbers = #tpu.dot_dimension_numbers<[1], [0], [0], [1], [0, 0, 1, 1], [], []>} : vector<128x64xbf16>, vector<64x64xbf16>, vector<128x64xf32> -> vector<128x64xf32>
    %c0_3 = arith.constant 0 : index
    %c0_4 = arith.constant 0 : index
    %3 = vector.load %arg3[%c0_3, %c0_4] : memref<1x64xf32, #tpu.memory_space<vmem>>, vector<1x64xf32>
    %4 = vector.broadcast %3 : vector<1x64xf32> to vector<128x64xf32>
    %5 = arith.addf %2, %4 : vector<128x64xf32>
    %cst_5 = arith.constant 0.000000e+00 : f32
    %6 = vector.broadcast %cst_5 : f32 to vector<128x64xf32>
    %7 = arith.maximumf %5, %6 : vector<128x64xf32>
    %c0_6 = arith.constant 0 : index
    %c0_7 = arith.constant 0 : index
    %8 = vector.load %arg4[%c0_6, %c0_7] : memref<1x64xf32, #tpu.memory_space<vmem>>, vector<1x64xf32>
    %9 = vector.broadcast %8 : vector<1x64xf32> to vector<128x64xf32>
    %10 = arith.mulf %7, %9 : vector<128x64xf32>
    %cst_8 = arith.constant dense<0.000000e+00> : vector<128xf32>
    %11 = vector.multi_reduction <add>, %10, %cst_8 [1] : vector<128x64xf32> to vector<128xf32>
    %12 = vector.shape_cast %11 : vector<128xf32> to vector<128x1xf32>
    %c0_9 = arith.constant 0 : index
    %c0_10 = arith.constant 0 : index
    %13 = vector.load %arg5[%c0_9, %c0_10] : memref<1x1xf32, #tpu.memory_space<vmem>>, vector<1x1xf32>
    %14 = vector.broadcast %13 : vector<1x1xf32> to vector<128x1xf32>
    %15 = arith.addf %12, %14 : vector<128x1xf32>
    %16 = arith.negf %15 : vector<128x1xf32>
    %17 = math.exp %16 : vector<128x1xf32>
    %cst_11 = arith.constant 1.000000e+00 : f32
    %18 = vector.broadcast %cst_11 : f32 to vector<128x1xf32>
    %19 = arith.addf %18, %17 : vector<128x1xf32>
    %20 = arith.divf %18, %19 : vector<128x1xf32>
    %c0_12 = arith.constant 0 : index
    %c0_13 = arith.constant 0 : index
    %21 = vector.load %arg6[%c0_12, %c0_13] : memref<128x1xf32, #tpu.memory_space<vmem>>, vector<128x1xf32>
    tpu.vector_store %arg6[%c0_12, %c0_13], %20 {strides = array<i32>} : memref<128x1xf32, #tpu.memory_space<vmem>>, vector<128x1xf32>,
    return
  }
  func.func @transform_0(%arg0: i32) -> (i32, i32) {
    %c0_i32 = arith.constant 0 : i32
    %c0_i32_0 = arith.constant 0 : i32
    return %arg0, %c0_i32 : i32, i32
  }
  func.func @transform_1(%arg0: i32) -> (i32, i32) {
    %c0_i32 = arith.constant 0 : i32
    %c0_i32_0 = arith.constant 0 : i32
    %c0_i32_1 = arith.constant 0 : i32
    return %c0_i32, %c0_i32_0 : i32, i32
  }
  func.func @transform_2(%arg0: i32) -> (i32, i32) {
    %c0_i32 = arith.constant 0 : i32
    %c0_i32_0 = arith.constant 0 : i32
    %c0_i32_1 = arith.constant 0 : i32
    return %c0_i32, %c0_i32_0 : i32, i32
  }
  func.func @transform_3(%arg0: i32) -> (i32, i32) {
    %c0_i32 = arith.constant 0 : i32
    %c0_i32_0 = arith.constant 0 : i32
    %c0_i32_1 = arith.constant 0 : i32
    return %c0_i32, %c0_i32_0 : i32, i32
  }
  func.func @transform_4(%arg0: i32) -> (i32, i32) {
    %c0_i32 = arith.constant 0 : i32
    %c0_i32_0 = arith.constant 0 : i32
    %c0_i32_1 = arith.constant 0 : i32
    return %c0_i32, %c0_i32_0 : i32, i32
  }
  func.func @transform_5(%arg0: i32) -> (i32, i32) {
    %c0_i32 = arith.constant 0 : i32
    %c0_i32_0 = arith.constant 0 : i32
    return %arg0, %c0_i32 : i32, i32
  }
}

</mosaic_0001>

<bundles_post_ra>
// kernel: fillsimnet_forward.5
= control target key start
LH: loop header
LB: loop body
LE: loop exit
PB: predicated region body
PF: predicated region fallthrough
CT: control target
= control target key end

     0   :  { %s959_s18 = smov 0   ;;  %s1134_s0 = inlined_call_operand.vmem [shape: f32[256,2], index: 0, kind: input, shape index: {}]   ;;  %s1135_s1 = inlined_call_operand.vmem [shape: f32[2,64], index: 1, kind: input, shape index: {}]   ;;  %s1136_s2 = inlined_call_operand.vmem [shape: f32[1,64], index: 2, kind: input, shape index: {}]   ;;  %s1137_s3 = inlined_call_operand.vmem [shape: bf16[64,64], index: 3, kind: input, shape index: {}]   ;;  %s1138_s4 = inlined_call_operand.vmem [shape: f32[1,64], index: 4, kind: input, shape index: {}]   ;;  %s1139_s5 = inlined_call_operand.vmem [shape: bf16[256,64], index: 5, kind: output, shape index: {}]  }
   0x1 LB: > { %s792_s19 = sadd.s32 4294967295, %s925_s18   ;;  %p796_p0 = scmp.ge.s32.totalorder %s925_s18, 1  ;;  %s925_s18 = sphi %s959_s18, %s15_s18  }
   0x2   : > { %p188_p1 = scmp.lt.s32.totalorder %s925_s18, 3 }
   0x4   : > { %p189_p2 = pnand %p796_p0, %p188_p1 }
   0x5   : > { %s797_s20 = sshll.u32 (!%p189_p2), %s792_s19, 4  ;;  %v927_v0 = vmov (!%p189_p2), 0   ;;  %v928_v6 = vmov (!%p189_p2), 1   ;;  %v915_v12 = vld [vmem:[%s1137_s3] sm:$0xff] (!%p189_p2)   ;;  %v916_v13 = vld [vmem:[%s1137_s3 + $0x8] sm:$0xff] (!%p189_p2)   ;;  %v917_v14 = vld [vmem:[%s1137_s3 + $0x10] sm:$0xff] (!%p189_p2)  }
   0x6   : > { %192 = sbr.rel (%p189_p2) target bundleno = 454 (0x1c6), region = 40  ;;  %906 = vset.pattern.permute.xlu1 (!%p189_p2), %v927_v0  ;;  %905 = vset.pattern.permute.xlu0 (!%p189_p2), %v927_v0  ;;  %p217_p3 = scmp.lt.s32.totalorder (!%p189_p2), %s797_s20, 31  ;;  %v918_v16 = vld [vmem:[%s1137_s3 + $0x18] sm:$0xff] (!%p189_p2)   ;;  %v1018_v29 = vld [vmem:[%s1135_s1 + $0x1] ss:$0 sm:$0xff] (!%p189_p2)  ;;  %vm533_vm0 = vcmask (!%p189_p2), 523264  }
   0x7   : > { %863 = vmatprep.subr.bf16.mxu0 (!%p189_p2), %v915_v12  ;;  %887 = vmatprep.subr.bf16.mxu1 (!%p189_p2), %v915_v12  ;;  %v1023_v31 = vld [vmem:[%s1135_s1] ss:$0 sm:$0xff] (!%p189_p2)  ;;  %vm719_vm1 = vcmask (!%p189_p2), 519168  }
   0x8   : > { %864 = vmatpush3.bf16.msra.mxu0 (!%p189_p2), %v915_v12  ;;  %891 = vmatpush3.bf16.msra.mxu1 (!%p189_p2), %v915_v12  ;;  %v1034_v40 = vld [vmem:[%s1136_s2] ss:$0 sm:$0xff] (!%p189_p2) }
   0x9   : > { %865 = vmatprep.subr.bf16.mxu0 (!%p189_p2), %v916_v13  ;;  %888 = vmatprep.subr.bf16.mxu1 (!%p189_p2), %v916_v13 }
   0xc   : > { %866 = vmatpush3.bf16.msra.mxu0 (!%p189_p2), %v916_v13  ;;  %892 = vmatpush3.bf16.msra.mxu1 (!%p189_p2), %v916_v13 }
   0xd   : > { %s1141_s20 = smov (!%p217_p3, %s797_s20), 31  ;;  %867 = vmatprep.subr.bf16.mxu0 %v917_v14  ;;  %889 = vmatprep.subr.bf16.mxu1 %v917_v14 }
   0xe   : > { %s798_s21 = sshll.u32 %s1141_s20, 3  ;;  %s800_s16 = sshll.u32 %s1141_s20, 2 }
   0xf   : > { %s975_s24 = scalar_lea.vmem %s1134_s0, %s798_s21  ;;  %s1097_s21 = scalar_lea.vmem %s1139_s5, %s800_s16 }
  0x10   : > { %v237_v1 = vld [vmem:[%s975_s24 + $0x40] sm:$0xff]  ;;  %v238_v3 = vld [vmem:[%s975_s24 + $0x48] sm:$0xff]  ;;  %v232_v5 = vld [vmem:[%s975_s24 + $0x18] sm:$0xff]  ;;  %868 = vmatpush3.bf16.msra.mxu0 %v917_v14  ;;  %893 = vmatpush3.bf16.msra.mxu1 %v917_v14 }
  0x11   : > { %v229_v2 = vld [vmem:[%s975_s24] sm:$0xff]  ;;  %288 = vperm.xlu1 %906, %v237_v1   ;;  %v230_v4 = vld [vmem:[%s975_s24 + $0x8] sm:$0xff]  ;;  %v236_v8 = vld [vmem:[%s975_s24 + $0x38] sm:$0xff]  ;;  %869 = vmatprep.subr.bf16.mxu0 %v918_v16 }
  0x12   : > { %248 = vperm.xlu0 %905, %v229_v2   ;;  %v234_v7 = vld [vmem:[%s975_s24 + $0x28] sm:$0xff]  ;;  %v231_v9 = vld [vmem:[%s975_s24 + $0x10] sm:$0xff]  ;;  %v240_v11 = vld [vmem:[%s975_s24 + $0x58] sm:$0xff]  ;;  %890 = vmatprep.subr.bf16.mxu1 %v918_v16 }
  0x13   : > { %v239_v10 = vld [vmem:[%s975_s24 + $0x50] sm:$0xff]  ;;  %v233_v15 = vld [vmem:[%s975_s24 + $0x20] sm:$0xff]  ;;  %v242_v17 = vld [vmem:[%s975_s24 + $0x68] sm:$0xff] }
  0x14   : > { %870 = vmatpush3.bf16.msra.mxu0 %v918_v16  ;;  %894 = vmatpush3.bf16.msra.mxu1 %v918_v16  ;;  %v241_v18 = vld [vmem:[%s975_s24 + $0x60] sm:$0xff]  ;;  %v235_v19 = vld [vmem:[%s975_s24 + $0x30] sm:$0xff]  ;;  %v244_v20 = vld [vmem:[%s975_s24 + $0x78] sm:$0xff] }
  0x15   : > { %293 = vperm.xlu1 %906, %v238_v3   ;;  %v243_v21 = vld [vmem:[%s975_s24 + $0x70] sm:$0xff] }
  0x16   : > { %253 = vperm.xlu0 %905, %v230_v4  }
  0x19   : > { %907 = vset.pattern.permute.xlu1 %v928_v6 }
  0x1a   : > { %263 = vperm.xlu0 %905, %v232_v5   ;;  %352 = vperm.xlu1 %907, %v230_v4  }
  0x1e   : > { %273 = vperm.xlu0 %905, %v234_v7   ;;  %380 = vperm.xlu1 %907, %v237_v1  }
  0x22   : > { %283 = vperm.xlu0 %905, %v236_v8   ;;  %908 = vset.pattern.permute.xlu1 %v927_v0 }
  0x23   : > { %258 = vperm.xlu1 %908, %v231_v9  }
  0x26   : > { %913 = vset.pattern.permute.xlu0 %v928_v6 }
  0x27   : > { %348 = vperm.xlu0 %913, %v229_v2   ;;  %298 = vperm.xlu1 %908, %v239_v10  }
  0x2b   : > { %384 = vperm.xlu0 %913, %v238_v3   ;;  %303 = vperm.xlu1 %908, %v240_v11  }
  0x2f   : > { %356 = vperm.xlu0 %913, %v231_v9   ;;  %909 = vset.pattern.permute.xlu1 %v928_v6 }
  0x30   : > { %360 = vperm.xlu1 %909, %v232_v5  }
  0x33   : > { %392 = vperm.xlu0 %913, %v240_v11  }
  0x34   : > { %388 = vperm.xlu1 %909, %v239_v10  }
  0x37   : > { %364 = vperm.xlu0 %913, %v233_v15  }
  0x38   : > { %910 = vset.pattern.permute.xlu1 %v927_v0 }
  0x39   : > { %268 = vperm.xlu1 %910, %v233_v15  }
  0x3b   : > { %400 = vperm.xlu0 %913, %v242_v17  }
  0x3d   : > { %308 = vperm.xlu1 %910, %v241_v18  }
  0x3f   : > { %372 = vperm.xlu0 %913, %v235_v19  }
  0x41   : > { %313 = vperm.xlu1 %910, %v242_v17  }
  0x43   : > { %408 = vperm.xlu0 %913, %v244_v20  }
  0x45   : > { %911 = vset.pattern.permute.xlu1 %v928_v6 }
  0x46   : > { %368 = vperm.xlu1 %911, %v234_v7  }
  0x4a   : > { %396 = vperm.xlu1 %911, %v241_v18  }
  0x4e   : > { %912 = vset.pattern.permute.xlu1 %v927_v0 }
  0x4f   : > { %278 = vperm.xlu1 %912, %v235_v19  }
  0x53   : > { %318 = vperm.xlu1 %912, %v243_v21  }
  0x57   : > { %323 = vperm.xlu1 %912, %v244_v20  }
  0x5b   : > { %914 = vset.pattern.permute.xlu1 %v928_v6 }
  0x5c   : > { %376 = vperm.xlu1 %914, %v236_v8  }
  0x60   : > { %404 = vperm.xlu1 %914, %v243_v21  }
  0x90   : > { %v289_v22 = vpop.permute.xlu1 %288 }
  0x91   : > { %v249_v23 = vpop.permute.xlu0 %248  ;;  %v338_v41 = vmul.f32 %v1023_v31, %v289_v22 }
  0x92   : > { %v330_v36 = vmul.f32 %v1023_v31, %v249_v23 }
  0x94   : > { %v294_v24 = vpop.permute.xlu1 %293 }
  0x95   : > { %v254_v25 = vpop.permute.xlu0 %253  ;;  %v339_v48 = vmul.f32 %v1023_v31, %v294_v24 }
  0x96   : > { %v331_v32 = vmul.f32 %v1023_v31, %v254_v25 }
  0x99   : > { %v264_v26 = vpop.permute.xlu0 %263  ;;  %v353_v27 = vpop.permute.xlu1 %352 }
  0x9a   : > { %v416_v33 = vmul.f32 %v1018_v29, %v353_v27  ;;  %v333_v56 = vmul.f32 %v1023_v31, %v264_v26 }
  0x9c   : > { %v432_v37 = vadd.f32 %v416_v33, %v331_v32 }
  0x9d   : > { %v1013_v28 = vpop.permute.xlu0 %273  ;;  %v381_v30 = vpop.permute.xlu1 %380 }
  0x9e   : > { %v423_v38 = vmul.f32 %v1018_v29, %v381_v30  ;;  %v455_v46 = vadd.f32 %v1034_v40, %v432_v37 }
  0xa0   : > { %v439_v44 = vadd.f32 %v423_v38, %v338_v41  ;;  %v471_v54 = vmax.f32 %v455_v46, 0.0  ;;  %v335_v38 = vmul.f32 %v1023_v31, %v1013_v28 }
  0xa1   : > { %v1027_v34 = vpop.permute.xlu0 %283 }
  0xa2   : > { %v259_v35 = vpop.permute.xlu1 %258  ;;  %v462_v55 = vadd.f32 %v1034_v40, %v439_v44 }
  0xa3   : > { %v332_v58 = vmul.f32 %v1023_v31, %v259_v35 }
  0xa4   : > { %v478_v1 = vmax.f32 %v462_v55, 0.0 }
  0xa6   : > { %v349_v39 = vpop.permute.xlu0 %348  ;;  %v299_v43 = vpop.permute.xlu1 %298 }
  0xa7   : > { %v415_v42 = vmul.f32 %v1018_v29, %v349_v39  ;;  %v340_v10 = vmul.f32 %v1023_v31, %v299_v43 }
  0xa9   : > { %v431_v45 = vadd.f32 %v415_v42, %v330_v36 }
  0xaa   : > { %v385_v47 = vpop.permute.xlu0 %384  ;;  %v304_v50 = vpop.permute.xlu1 %303 }
  0xab   : > { %v424_v49 = vmul.f32 %v1018_v29, %v385_v47  ;;  %v454_v51 = vadd.f32 %v1034_v40, %v431_v45  ;;  %v341_v3 = vmul.f32 %v1023_v31, %v304_v50 }
  0xad   : > { %v440_v52 = vadd.f32 %v424_v49, %v339_v48  ;;  %v470_v53 = vmax.f32 %v454_v51, 0.0 }
  0xae   : > { %v357_v57 = vpop.permute.xlu0 %356 }
  0xaf   : > { %v417_v59 = vmul.f32 %v1018_v29, %v357_v57  ;;  %v486_v60 = vpack.c.bf16 %v471_v54, %v470_v53  ;;  %v463_v61 = vadd.f32 %v1034_v40, %v440_v52  ;;  %v361_v62 = vpop.permute.xlu1 %360 }
  0xb0   : > { %v418_v0 = vmul.f32 %v1018_v29, %v361_v62 }
  0xb1   : > { %v433_v63 = vadd.f32 %v417_v59, %v332_v58  ;;  %871 = vmatprep.mubr.msk.bf16.mxu0 %vm533_vm0, %v486_v60  ;;  %v479_v2 = vmax.f32 %v463_v61, 0.0 }
  0xb2   : > { %v393_v4 = vpop.permute.xlu0 %392  ;;  %v434_v6 = vadd.f32 %v418_v0, %v333_v56 }
  0xb3   : > { %v456_v5 = vadd.f32 %v1034_v40, %v433_v63  ;;  %v426_v7 = vmul.f32 %v1018_v29, %v393_v4  ;;  %v490_v8 = vpack.c.bf16 %v479_v2, %v478_v1  ;;  %v389_v9 = vpop.permute.xlu1 %388  ;;  %v337_v2 = vmul.f32 %v1023_v31, %v1027_v34 }
  0xb4   : > { %v457_v11 = vadd.f32 %v1034_v40, %v434_v6  ;;  %v425_v13 = vmul.f32 %v1018_v29, %v389_v9 }
  0xb5   : > { %v442_v12 = vadd.f32 %v426_v7, %v341_v3  ;;  %879 = vmatprep.mubr.msk.bf16.mxu1 %vm533_vm0, %v490_v8  ;;  %v472_v14 = vmax.f32 %v456_v5, 0.0 }
  0xb6   : > { %v473_v15 = vmax.f32 %v457_v11, 0.0  ;;  %v441_v17 = vadd.f32 %v425_v13, %v340_v10  ;;  %v365_v25 = vpop.permute.xlu0 %364 }
  0xb7   : > { %v465_v16 = vadd.f32 %v1034_v40, %v442_v12  ;;  %v419_v26 = vmul.f32 %v1018_v29, %v365_v25 }
  0xb8   : > { %v487_v18 = vpack.c.bf16 %v473_v15, %v472_v14  ;;  %v464_v19 = vadd.f32 %v1034_v40, %v441_v17  ;;  %v269_v20 = vpop.permute.xlu1 %268 }
  0xb9   : > { %v481_v21 = vmax.f32 %v465_v16, 0.0  ;;  %v334_v27 = vmul.f32 %v1023_v31, %v269_v20 }
  0xba   : > { %v480_v22 = vmax.f32 %v464_v19, 0.0  ;;  %872 = vmatmul.mubr.msk.bf16.vlgmr.msra.gmra.mrb[0].mxu0 %vm533_vm0, %v487_v18  ;;  %v401_v32 = vpop.permute.xlu0 %400 }
  0xbb   : > { %v435_v33 = vadd.f32 %v419_v26, %v334_v27  ;;  %v428_v35 = vmul.f32 %v1018_v29, %v401_v32 }
  0xbc   : > { %v491_v23 = vpack.c.bf16 %v481_v21, %v480_v22  ;;  %v309_v24 = vpop.permute.xlu1 %308 }
  0xbd   : > { %v458_v41 = vadd.f32 %v1034_v40, %v435_v33  ;;  %v342_v45 = vmul.f32 %v1023_v31, %v309_v24 }
  0xbe   : > { %880 = vmatmul.mubr.msk.bf16.vlgmr.msra.gmra.mrb[0].mxu1 %vm533_vm0, %v491_v23  ;;  %v373_v58 = vpop.permute.xlu0 %372 }
  0xbf   : > { %v474_v48 = vmax.f32 %v458_v41, 0.0  ;;  %v421_v61 = vmul.f32 %v1018_v29, %v373_v58 }
  0xc0   : > { %v314_v30 = vpop.permute.xlu1 %313 }
  0xc1   : > { %v343_v36 = vmul.f32 %v1023_v31, %v314_v30 }
  0xc2   : > { %v409_v62 = vpop.permute.xlu0 %408 }
  0xc3   : > { %v444_v42 = vadd.f32 %v428_v35, %v343_v36  ;;  %v430_v3 = vmul.f32 %v1018_v29, %v409_v62 }
  0xc5   : > { %v369_v37 = vpop.permute.xlu1 %368  ;;  %v467_v49 = vadd.f32 %v1034_v40, %v444_v42 }
  0xc6   : > { %v420_v39 = vmul.f32 %v1018_v29, %v369_v37 }
  0xc7   : > { %v483_v54 = vmax.f32 %v467_v49, 0.0 }
  0xc8   : > { %v436_v43 = vadd.f32 %v420_v39, %v335_v38 }
  0xc9   : > { %v397_v44 = vpop.permute.xlu1 %396 }
  0xca   : > { %v459_v46 = vadd.f32 %v1034_v40, %v436_v43  ;;  %v427_v47 = vmul.f32 %v1018_v29, %v397_v44 }
  0xcc   : > { %v475_v50 = vmax.f32 %v459_v46, 0.0  ;;  %v443_v51 = vadd.f32 %v427_v47, %v342_v45 }
  0xce   : > { %v488_v52 = vpack.c.bf16 %v475_v50, %v474_v48  ;;  %v466_v28 = vadd.f32 %v1034_v40, %v443_v51  ;;  %v279_v53 = vpop.permute.xlu1 %278 }
  0xcf   : > { %v336_v59 = vmul.f32 %v1023_v31, %v279_v53 }
  0xd0   : > { %v482_v55 = vmax.f32 %v466_v28, 0.0  ;;  %875 = vmatprep.mubr.msk.bf16.mxu0 %vm533_vm0, %v488_v52 }
  0xd1   : > { %v437_v63 = vadd.f32 %v421_v61, %v336_v59 }
  0xd2   : > { %v492_v56 = vpack.c.bf16 %v483_v54, %v482_v55  ;;  %v319_v57 = vpop.permute.xlu1 %318 }
  0xd3   : > { %v460_v5 = vadd.f32 %v1034_v40, %v437_v63  ;;  %v344_v9 = vmul.f32 %v1023_v31, %v319_v57 }
  0xd4   : > { %883 = vmatprep.mubr.msk.bf16.mxu1 %vm533_vm0, %v492_v56 }
  0xd5   : > { %v476_v12 = vmax.f32 %v460_v5, 0.0 }
  0xd6   : > { %v324_v60 = vpop.permute.xlu1 %323 }
  0xd7   : > { %v345_v0 = vmul.f32 %v1023_v31, %v324_v60  ;;  %v804_v31 = vld [vmem:[%s1138_s4] ss:$0 sm:$0xff] }
  0xd9   : > { %v446_v6 = vadd.f32 %v430_v3, %v345_v0 }
  0xdb   : > { %v377_v1 = vpop.permute.xlu1 %376  ;;  %v469_v13 = vadd.f32 %v1034_v40, %v446_v6 }
  0xdc   : > { %v422_v4 = vmul.f32 %v1018_v29, %v377_v1 }
  0xdd   : > { %v485_v17 = vmax.f32 %v469_v13, 0.0 }
  0xde   : > { %v438_v7 = vadd.f32 %v422_v4, %v337_v2 }
  0xdf   : > { %v405_v8 = vpop.permute.xlu1 %404 }
  0xe0   : > { %v461_v10 = vadd.f32 %v1034_v40, %v438_v7  ;;  %v429_v11 = vmul.f32 %v1018_v29, %v405_v8 }
  0xe2   : > { %v477_v34 = vmax.f32 %v461_v10, 0.0  ;;  %v445_v14 = vadd.f32 %v429_v11, %v344_v9 }
  0xe4   : > { %v489_v15 = vpack.c.bf16 %v477_v34, %v476_v12  ;;  %v468_v16 = vadd.f32 %v1034_v40, %v445_v14 }
  0xe6   : > { %v484_v18 = vmax.f32 %v468_v16, 0.0  ;;  %876 = vmatmul.mubr.msk.bf16.gmra.mrb[4].mxu0 %vm533_vm0, %v489_v15 }
  0xe8   : > { %v493_v19 = vpack.c.bf16 %v485_v17, %v484_v18 }
  0xea   : > { %884 = vmatmul.mubr.msk.bf16.gmra.mrb[4].mxu1 %vm533_vm0, %v493_v19 }
 0x18d   : > { %v873_v29 = vpop.f32.mrb[0].mxu0 }
 0x18e   : > { %v601_v20 = vadd.f32 %v873_v29, %v804_v31  ;;  %v592_v21 = vpop.f32.mrb[1].mxu0 }
 0x18f   : > { %v593_v40 = vadd.f32 %v804_v31, %v592_v21  ;;  %v874_v22 = vpop.f32.mrb[2].mxu0 }
 0x190   : > { %v837_v23 = vpack.c.bf16 %v601_v20, %v601_v20  ;;  %v604_v24 = vadd.f32 %v874_v22, %v804_v31  ;;  %v595_v25 = vpop.f32.mrb[3].mxu0 }
 0x191   : > { %v835_v26 = vpack.c.bf16 %v593_v40, %v593_v40  ;;  %v596_v27 = vadd.f32 %v804_v31, %v595_v25  ;;  %v881_v30 = vpop.f32.mrb[0].mxu1 }
 0x192   : > { %722 = vst.msk [vmem:[%s1097_s21 + $0x8] sm:$0xf] %vm719_vm1, %v837_v23  ;;  %v838_v32 = vpack.c.bf16 %v604_v24, %v604_v24  ;;  %v633_v33 = vadd.f32 %v881_v30, %v804_v31  ;;  %v624_v35 = vpop.f32.mrb[1].mxu1 }
 0x193   : > { %720 = vst.msk [vmem:[%s1097_s21] sm:$0xf] %vm719_vm1, %v835_v26  ;;  %v836_v36 = vpack.c.bf16 %v596_v27, %v596_v27  ;;  %v625_v37 = vadd.f32 %v804_v31, %v624_v35  ;;  %v882_v38 = vpop.f32.mrb[2].mxu1 }
 0x194   : > { %723 = vst.msk [vmem:[%s1097_s21 + $0xc] sm:$0xf] %vm719_vm1, %v838_v32  ;;  %v845_v39 = vpack.c.bf16 %v633_v33, %v633_v33  ;;  %v636_v41 = vadd.f32 %v882_v38, %v804_v31  ;;  %v627_v42 = vpop.f32.mrb[3].mxu1 }
 0x195   : > { %721 = vst.msk [vmem:[%s1097_s21 + $0x4] sm:$0xf] %vm719_vm1, %v836_v36  ;;  %v843_v43 = vpack.c.bf16 %v625_v37, %v625_v37  ;;  %v628_v44 = vadd.f32 %v804_v31, %v627_v42 }
 0x196   : > { %730 = vst.msk [vmem:[%s1097_s21 + $0x28] sm:$0xf] %vm719_vm1, %v845_v39  ;;  %v846_v45 = vpack.c.bf16 %v636_v41, %v636_v41 }
 0x197   : > { %728 = vst.msk [vmem:[%s1097_s21 + $0x20] sm:$0xf] %vm719_vm1, %v843_v43  ;;  %v844_v46 = vpack.c.bf16 %v628_v44, %v628_v44 }
 0x198   : > { %731 = vst.msk [vmem:[%s1097_s21 + $0x2c] sm:$0xf] %vm719_vm1, %v846_v45 }
 0x199   : > { %729 = vst.msk [vmem:[%s1097_s21 + $0x24] sm:$0xf] %vm719_vm1, %v844_v46 }
 0x1b9   : > { %v877_v47 = vpop.f32.mrb[4].mxu0 }
 0x1ba   : > { %v617_v48 = vadd.f32 %v877_v47, %v804_v31  ;;  %v608_v49 = vpop.f32.mrb[5].mxu0 }
 0x1bb   : > { %v609_v50 = vadd.f32 %v804_v31, %v608_v49  ;;  %v878_v51 = vpop.f32.mrb[6].mxu0 }
 0x1bc   : > { %v841_v52 = vpack.c.bf16 %v617_v48, %v617_v48  ;;  %v620_v28 = vadd.f32 %v878_v51, %v804_v31  ;;  %v611_v53 = vpop.f32.mrb[7].mxu0 }
 0x1bd   : > { %v839_v54 = vpack.c.bf16 %v609_v50, %v609_v50  ;;  %v612_v55 = vadd.f32 %v804_v31, %v611_v53  ;;  %v885_v56 = vpop.f32.mrb[4].mxu1 }
 0x1be   : > { %726 = vst.msk [vmem:[%s1097_s21 + $0x18] sm:$0xf] %vm719_vm1, %v841_v52  ;;  %v842_v57 = vpack.c.bf16 %v620_v28, %v620_v28  ;;  %v649_v58 = vadd.f32 %v885_v56, %v804_v31  ;;  %v640_v59 = vpop.f32.mrb[5].mxu1 }
 0x1bf   : > { %724 = vst.msk [vmem:[%s1097_s21 + $0x10] sm:$0xf] %vm719_vm1, %v839_v54  ;;  %v840_v60 = vpack.c.bf16 %v612_v55, %v612_v55  ;;  %v641_v61 = vadd.f32 %v804_v31, %v640_v59  ;;  %v886_v62 = vpop.f32.mrb[6].mxu1 }
 0x1c0   : > { %727 = vst.msk [vmem:[%s1097_s21 + $0x1c] sm:$0xf] %vm719_vm1, %v842_v57  ;;  %v849_v63 = vpack.c.bf16 %v649_v58, %v649_v58  ;;  %v652_v0 = vadd.f32 %v886_v62, %v804_v31  ;;  %v643_v1 = vpop.f32.mrb[7].mxu1 }
 0x1c1   : > { %725 = vst.msk [vmem:[%s1097_s21 + $0x14] sm:$0xf] %vm719_vm1, %v840_v60  ;;  %v847_v2 = vpack.c.bf16 %v641_v61, %v641_v61  ;;  %v644_v3 = vadd.f32 %v804_v31, %v643_v1 }
 0x1c2   : > { %734 = vst.msk [vmem:[%s1097_s21 + $0x38] sm:$0xf] %vm719_vm1, %v849_v63  ;;  %v850_v4 = vpack.c.bf16 %v652_v0, %v652_v0 }
 0x1c3   : > { %732 = vst.msk [vmem:[%s1097_s21 + $0x30] sm:$0xf] %vm719_vm1, %v847_v2  ;;  %v848_v5 = vpack.c.bf16 %v644_v3, %v644_v3 }
 0x1c4   : > { %735 = vst.msk [vmem:[%s1097_s21 + $0x3c] sm:$0xf] %vm719_vm1, %v850_v4 }
 0x1c5   : > { %733 = vst.msk [vmem:[%s1097_s21 + $0x34] sm:$0xf] %vm719_vm1, %v848_v5 }
 0x1c6 PF: > { %s15_s18 = sadd.s32 1, %s925_s18  }
 0x1c7   : > { %p12_p4 = scmp.ge.s32.totalorder %s15_s18, 4  }
 0x1c9   :  { %14 = sbr.rel (!%p12_p4) target bundleno = 1 (0x1), region = 70 }

// kernel: fillsimnet_forward.6
= control target key start
LH: loop header
LB: loop body
LE: loop exit
PB: predicated region body
PF: predicated region fallthrough
CT: control target
= control target key end

     0   :  { %s1340_s15 = smov 0   ;;  %s1342_s16 = smov 0   ;;  %s1561_s0 = inlined_call_operand.vmem [shape: bf16[256,256], index: 0, kind: input, shape index: {}]   ;;  %s1562_s1 = inlined_call_operand.vmem [shape: bf16[256,64], index: 1, kind: input, shape index: {}]   ;;  %s1563_s2 = inlined_call_operand.vmem [shape: bf16[64,64], index: 2, kind: input, shape index: {}]   ;;  %s1564_s3 = inlined_call_operand.vmem [shape: f32[1,64], index: 3, kind: input, shape index: {}]   ;;  %s1565_s4 = inlined_call_operand.vmem [shape: bf16[256,64], index: 4, kind: output, shape index: {}]  }
   0x1   :  { %s1344_s17 = smov 0   ;;  %s1346_s18 = smov 0  }
   0x2   :  { %s1348_s19 = smov 0   ;;  %s1350_s20 = smov 0  }
   0x3   :  { %s1352_s21 = smov 0  }
   0x4 LB: > { %s23_s22 = sadd.s32 1, %s1304_s19  ;;  %s26_s23 = sadd.s32 1, %s1308_s20  ;;  %s1312_s21 = sphi %s1352_s21, %s14_s21   ;;  %s1308_s20 = sphi %s1350_s20, %s1571_s20   ;;  %s1304_s19 = sphi %s1348_s19, %s1570_s19   ;;  %s1300_s18 = sphi %s1346_s18, %s1569_s18   ;;  %s1296_s17 = sphi %s1344_s17, %s1568_s17   ;;  %s1292_s16 = sphi %s1342_s16, %s1567_s16   ;;  %s1288_s15 = sphi %s1340_s15, %s1566_s15  }
   0x5   : > { %p24_p0 = scmp.ge.s32.totalorder %s23_s22, 2  ;;  %p42_p1 = scmp.ne.s32.totalorder %s1292_s16, %s1288_s15 }
   0x6   : > { %p43_p2 = scmp.eq.s32.totalorder %s1312_s21, 0  ;;  %s35_s27 = sadd.s32 1, %s1292_s16 }
   0x7   : > { %s1573_s22 = smov (%p24_p0, %s23_s22), 0  ;;  %s1575_s23 = smov (!%p24_p0, %s26_s23), %s1308_s20 }
   0x8   : > { %p44_p3 = por %p43_p2, %p42_p1  ;;  %p28_p4 = scmp.ge.s32.totalorder %s1575_s23, 2 }
   0x9   : > { %s31_s24 = ssub.s32 %s1304_s19, %s1573_s22  ;;  %p996_p6 = scmp.ge.s32.totalorder %s1312_s21, 4 }
   0xa   : > { %s1577_s23 = smov (%p28_p4, %s1575_s23), 0 }
   0xb   : > { %s30_s25 = ssub.s32 %s1308_s20, %s1577_s23  ;;  %168 = sbr.rel (%p996_p6) target bundleno = 34 (0x22), region = 24 }
   0xc   : > { %s32_s26 = sor.u32 %s31_s24, %s30_s25 }
   0xd   : > { %p33_p5 = scmp.eq.s32.totalorder %s32_s26, 0 }
   0xf   : > { %s1391_s28 = scalar_select %p33_p5, %s1292_s16, %s35_s27  }
  0x12   : > { %171 = sbr.rel (!%p44_p3) target bundleno = 34 (0x22), region = 28  ;;  %s173_s29 = sand.u32 (%p44_p3), 1, %s1292_s16  }
  0x13   : > { %s1056_s30 = sshll.u32 (%p44_p3), %s1308_s20, 5  ;;  %s997_s5 = sshll.u32 (%p44_p3), %s173_s29, 6 }
  0x14   : > { %s178_s6 = sadd.s32 (%p44_p3), %s1304_s19, %s1056_s30  ;;  %s175_s11 = scalar_lea.vmem (%p44_p3), [#allocation3], %s997_s5 }
  0x15   : > { %s1000_s7 = sshll.u32 (%p44_p3), %s178_s6, 2 }
  0x16   : > { %s1400_s10 = scalar_lea.vmem (%p44_p3), %s1561_s0, %s1000_s7 }
  0x17   : > { %v196_v0 = vld [vmem:[%s1400_s10] sm:$0xf] (%p44_p3)  ;;  %v198_v1 = vld [vmem:[%s1400_s10 + $0x8] sm:$0xf] (%p44_p3)  ;;  %v200_v2 = vld [vmem:[%s1400_s10 + $0x10] sm:$0xf] (%p44_p3) }
  0x18   : > { %197 = vst [vmem:[%s175_s11] sm:$0xf] (%p44_p3), %v196_v0  ;;  %199 = vst [vmem:[%s175_s11 + $0x4] sm:$0xf] (%p44_p3), %v198_v1  ;;  %v202_v3 = vld [vmem:[%s1400_s10 + $0x18] sm:$0xf] (%p44_p3) }
  0x19   : > { %201 = vst [vmem:[%s175_s11 + $0x8] sm:$0xf] %v200_v2  ;;  %v204_v4 = vld [vmem:[%s1400_s10 + $0x20] sm:$0xf]  ;;  %v206_v5 = vld [vmem:[%s1400_s10 + $0x28] sm:$0xf] }
  0x1a   : > { %203 = vst [vmem:[%s175_s11 + $0xc] sm:$0xf] %v202_v3  ;;  %205 = vst [vmem:[%s175_s11 + $0x10] sm:$0xf] %v204_v4  ;;  %v208_v6 = vld [vmem:[%s1400_s10 + $0x30] sm:$0xf] }
  0x1b   : > { %207 = vst [vmem:[%s175_s11 + $0x14] sm:$0xf] %v206_v5  ;;  %v210_v7 = vld [vmem:[%s1400_s10 + $0x38] sm:$0xf]  ;;  %v212_v8 = vld [vmem:[%s1400_s10 + $0x40] sm:$0xf] }
  0x1c   : > { %209 = vst [vmem:[%s175_s11 + $0x18] sm:$0xf] %v208_v6  ;;  %211 = vst [vmem:[%s175_s11 + $0x1c] sm:$0xf] %v210_v7  ;;  %v214_v9 = vld [vmem:[%s1400_s10 + $0x48] sm:$0xf] }
  0x1d   : > { %213 = vst [vmem:[%s175_s11 + $0x20] sm:$0xf] %v212_v8  ;;  %v216_v10 = vld [vmem:[%s1400_s10 + $0x50] sm:$0xf]  ;;  %v218_v11 = vld [vmem:[%s1400_s10 + $0x58] sm:$0xf] }
  0x1e   : > { %215 = vst [vmem:[%s175_s11 + $0x24] sm:$0xf] %v214_v9  ;;  %217 = vst [vmem:[%s175_s11 + $0x28] sm:$0xf] %v216_v10  ;;  %v220_v12 = vld [vmem:[%s1400_s10 + $0x60] sm:$0xf] }
  0x1f   : > { %219 = vst [vmem:[%s175_s11 + $0x2c] sm:$0xf] %v218_v11  ;;  %v222_v13 = vld [vmem:[%s1400_s10 + $0x68] sm:$0xf]  ;;  %v224_v14 = vld [vmem:[%s1400_s10 + $0x70] sm:$0xf] }
  0x20   : > { %221 = vst [vmem:[%s175_s11 + $0x30] sm:$0xf] %v220_v12  ;;  %223 = vst [vmem:[%s175_s11 + $0x34] sm:$0xf] %v222_v13  ;;  %v226_v15 = vld [vmem:[%s1400_s10 + $0x78] sm:$0xf] }
  0x21   : > { %225 = vst [vmem:[%s175_s11 + $0x38] sm:$0xf] %v224_v14  ;;  %227 = vst [vmem:[%s175_s11 + $0x3c] sm:$0xf] %v226_v15 }
  0x22 PF: > { %p1001_p7 = scmp.ge.s32.totalorder %s1312_s21, 1  ;;  %p290_p8 = scmp.lt.s32.totalorder %s1312_s21, 5 }
  0x24   : > { %p291_p9 = pnand %p1001_p7, %p290_p8 }
  0x25   : > { %s297_s12 = sand.u32 (!%p291_p9), 1, %s1288_s15   ;;  %s1003_s13 = sshll.u32 (!%p291_p9), %s1296_s17, 4 }
  0x26   : > { %294 = sbr.rel (%p291_p9) target bundleno = 545 (0x221), region = 73  ;;  %s1002_s14 = sshll.u32 (!%p291_p9), %s297_s12, 6 }
  0x27   : > { %p329_p10 = scmp.lt.s32.totalorder (!%p291_p9), %s1003_s13, 31  ;;  %s1005_s24 = sshll.u32 (!%p291_p9), %s1300_s18, 4 }
  0x28   : > { %p335_p11 = scmp.lt.s32.totalorder (!%p291_p9), %s1005_s24, 31  ;;  %s1433_s15 = scalar_lea.vmem (!%p291_p9), [#allocation3], %s1002_s14 }
  0x29   : > { %p1007_p12 = scmp.ne.s32.totalorder (!%p291_p9), %s1296_s17, 0 }
  0x2d   : > { %s1579_s13 = smov (!%p329_p10, %s1003_s13), 31  ;;  %s1581_s24 = smov (!%p335_p11, %s1005_s24), 31 }
  0x2e   : > { %s1004_s25 = sshll.u32 %s1579_s13, 2  ;;  %s1006_s30 = sshll.u32 %s1581_s24, 2  ;;  %vm345_vm0 = vcmask (!%p1007_p12), 523264   ;;  %v1314_v16 = vmov (!%p1007_p12), 0.0  }
  0x2f   : > { %s1426_s29 = scalar_lea.vmem %s1562_s1, %s1004_s25  ;;  %s1431_s7 = scalar_lea.vmem %s1565_s4, %s1006_s30  ;;  %346 = vst.msk [vmem:[#allocation2] sm:$0xff] (!%p1007_p12), %vm345_vm0, %v1314_v16  ;;  %347 = vst.msk [vmem:[#allocation2 + $0x8] sm:$0xff] (!%p1007_p12), %vm345_vm0, %v1314_v16 }
  0x30   : > { %344 = sbr.rel (%p1007_p12) target bundleno = 55 (0x37), region = 81  ;;  %348 = vst.msk [vmem:[#allocation2 + $0x10] sm:$0xff] (!%p1007_p12), %vm345_vm0, %v1314_v16  ;;  %349 = vst.msk [vmem:[#allocation2 + $0x18] sm:$0xff] (!%p1007_p12), %vm345_vm0, %v1314_v16 }
  0x31   : > { %350 = vst.msk [vmem:[#allocation2 + $0x20] sm:$0xff] (!%p1007_p12), %vm345_vm0, %v1314_v16  ;;  %351 = vst.msk [vmem:[#allocation2 + $0x28] sm:$0xff] (!%p1007_p12), %vm345_vm0, %v1314_v16 }
  0x32   : > { %352 = vst.msk [vmem:[#allocation2 + $0x30] sm:$0xff] (!%p1007_p12), %vm345_vm0, %v1314_v16  ;;  %353 = vst.msk [vmem:[#allocation2 + $0x38] sm:$0xff] (!%p1007_p12), %vm345_vm0, %v1314_v16 }
  0x33   : > { %354 = vst.msk [vmem:[#allocation2 + $0x40] sm:$0xff] (!%p1007_p12), %vm345_vm0, %v1314_v16  ;;  %355 = vst.msk [vmem:[#allocation2 + $0x48] sm:$0xff] (!%p1007_p12), %vm345_vm0, %v1314_v16 }
  0x34   : > { %356 = vst.msk [vmem:[#allocation2 + $0x50] sm:$0xff] (!%p1007_p12), %vm345_vm0, %v1314_v16  ;;  %357 = vst.msk [vmem:[#allocation2 + $0x58] sm:$0xff] (!%p1007_p12), %vm345_vm0, %v1314_v16 }
  0x35   : > { %358 = vst.msk [vmem:[#allocation2 + $0x60] sm:$0xff] (!%p1007_p12), %vm345_vm0, %v1314_v16  ;;  %359 = vst.msk [vmem:[#allocation2 + $0x68] sm:$0xff] (!%p1007_p12), %vm345_vm0, %v1314_v16 }
  0x36   : > { %360 = vst.msk [vmem:[#allocation2 + $0x70] sm:$0xff] (!%p1007_p12), %vm345_vm0, %v1314_v16  ;;  %361 = vst.msk [vmem:[#allocation2 + $0x78] sm:$0xff] (!%p1007_p12), %vm345_vm0, %v1314_v16 }
  0x37 PF: > { %v1238_v17 = vld [vmem:[%s1426_s29] sm:$0xff]   ;;  %v1239_v18 = vld [vmem:[%s1426_s29 + $0x8] sm:$0xff]   ;;  %v1240_v19 = vld [vmem:[%s1426_s29 + $0x10] sm:$0xff]   ;;  %vm619_vm1 = vcmask 523264   ;;  %p1024_p13 = scmp.ne.s32.totalorder %s1296_s17, 1 }
  0x38   : > { %1101 = vmatprep.subr.bf16.mxu0 %v1238_v17  ;;  %1157 = vmatprep.subr.bf16.mxu1 %v1238_v17  ;;  %v1241_v20 = vld [vmem:[%s1426_s29 + $0x18] sm:$0xff]   ;;  %v1246_v21 = vld [vmem:[%s1433_s15] sm:$0xff]   ;;  %v1243_v24 = vld [vmem:[%s1426_s29 + $0x28] sm:$0xff]   ;;  %vm888_vm2 = vcmask (!%p1024_p13), 519168  }
  0x39   : > { %1102 = vmatpush3.bf16.msra.mxu0 %v1238_v17  ;;  %1165 = vmatpush3.bf16.msra.mxu1 %v1238_v17  ;;  %v1247_v22 = vld [vmem:[%s1433_s15 + $0x20] sm:$0xff]   ;;  %v1244_v25 = vld [vmem:[%s1426_s29 + $0x30] sm:$0xff]   ;;  %v1245_v26 = vld [vmem:[%s1426_s29 + $0x38] sm:$0xff]  }
  0x3a   : > { %1103 = vmatprep.subr.bf16.mxu0 %v1239_v18  ;;  %1158 = vmatprep.subr.bf16.mxu1 %v1239_v18  ;;  %v1242_v23 = vld [vmem:[%s1426_s29 + $0x20] sm:$0xff]   ;;  %v1248_v27 = vld [vmem:[%s1433_s15 + $0x8] sm:$0xff]   ;;  %v1250_v29 = vld [vmem:[%s1433_s15 + $0x10] sm:$0xff]  }
  0x3b   : > { %1117 = vmatprep.mubr.bf16.mxu0 %v1246_v21  ;;  %1125 = vmatprep.mubr.bf16.mxu1 %v1247_v22  ;;  %v1249_v28 = vld [vmem:[%s1433_s15 + $0x28] sm:$0xff]   ;;  %v1251_v30 = vld [vmem:[%s1433_s15 + $0x30] sm:$0xff]   ;;  %v1252_v31 = vld [vmem:[%s1433_s15 + $0x18] sm:$0xff]  }
  0x3c   : > { %v1253_v32 = vld [vmem:[%s1433_s15 + $0x38] sm:$0xff]   ;;  %v364_v33 = vld [vmem:[#allocation2 + $0x10] sm:$0xff]  ;;  %v362_v35 = vld [vmem:[#allocation2] sm:$0xff] }
  0x3d   : > { %1104 = vmatpush3.bf16.msra.mxu0 %v1239_v18  ;;  %1166 = vmatpush3.bf16.msra.mxu1 %v1239_v18  ;;  %v372_v34 = vld [vmem:[#allocation2 + $0x50] sm:$0xff]  ;;  %v370_v36 = vld [vmem:[#allocation2 + $0x40] sm:$0xff]  ;;  %v365_v39 = vld [vmem:[#allocation2 + $0x18] sm:$0xff] }
  0x3e   : > { %1105 = vmatprep.subr.bf16.mxu0 %v1240_v19  ;;  %1159 = vmatprep.subr.bf16.mxu1 %v1240_v19  ;;  %v373_v40 = vld [vmem:[#allocation2 + $0x58] sm:$0xff]  ;;  %v363_v45 = vld [vmem:[#allocation2 + $0x8] sm:$0xff]  ;;  %v368_v57 = vld [vmem:[#allocation2 + $0x30] sm:$0xff] }
  0x3f   : > { %v371_v46 = vld [vmem:[#allocation2 + $0x48] sm:$0xff]  ;;  %v376_v58 = vld [vmem:[#allocation2 + $0x70] sm:$0xff]  ;;  %v366_v59 = vld [vmem:[#allocation2 + $0x20] sm:$0xff] }
  0x40   : > { %v374_v60 = vld [vmem:[#allocation2 + $0x60] sm:$0xff]  ;;  %v369_v63 = vld [vmem:[#allocation2 + $0x38] sm:$0xff]  ;;  %v367_v5 = vld [vmem:[#allocation2 + $0x28] sm:$0xff] }
  0x41   : > { %1106 = vmatpush3.bf16.msra.mxu0 %v1240_v19  ;;  %1167 = vmatpush3.bf16.msra.mxu1 %v1240_v19  ;;  %v377_v0 = vld [vmem:[#allocation2 + $0x78] sm:$0xff]  ;;  %v375_v6 = vld [vmem:[#allocation2 + $0x68] sm:$0xff]  ;;  %v1254_v17 = vld [vmem:[%s1563_s2] sm:$0xff] (!%p1024_p13)  }
  0x42   : > { %1107 = vmatprep.subr.bf16.mxu0 %v1241_v20  ;;  %1160 = vmatprep.subr.bf16.mxu1 %v1241_v20  ;;  %v1255_v18 = vld [vmem:[%s1563_s2 + $0x8] sm:$0xff] (!%p1024_p13)   ;;  %v1256_v19 = vld [vmem:[%s1563_s2 + $0x10] sm:$0xff] (!%p1024_p13)  }
  0x45   : > { %1108 = vmatpush3.bf16.msra.mxu0 %v1241_v20  ;;  %1168 = vmatpush3.bf16.msra.mxu1 %v1241_v20 }
  0x46   : > { %1109 = vmatprep.subr.bf16.mxu0 %v1242_v23  ;;  %1161 = vmatprep.subr.bf16.mxu1 %v1242_v23 }
  0x49   : > { %1110 = vmatpush3.bf16.msra.mxu0 %v1242_v23  ;;  %1169 = vmatpush3.bf16.msra.mxu1 %v1242_v23 }
  0x4a   : > { %1111 = vmatprep.subr.bf16.mxu0 %v1243_v24  ;;  %1162 = vmatprep.subr.bf16.mxu1 %v1243_v24 }
  0x4d   : > { %1112 = vmatpush3.bf16.msra.mxu0 %v1243_v24  ;;  %1170 = vmatpush3.bf16.msra.mxu1 %v1243_v24 }
  0x4e   : > { %1113 = vmatprep.subr.bf16.mxu0 %v1244_v25  ;;  %1163 = vmatprep.subr.bf16.mxu1 %v1244_v25 }
  0x51   : > { %1114 = vmatpush3.bf16.msra.mxu0 %v1244_v25  ;;  %1171 = vmatpush3.bf16.msra.mxu1 %v1244_v25 }
  0x52   : > { %1115 = vmatprep.subr.bf16.mxu0 %v1245_v26  ;;  %1164 = vmatprep.subr.bf16.mxu1 %v1245_v26 }
  0x55   : > { %1116 = vmatpush3.bf16.msra.mxu0 %v1245_v26  ;;  %1172 = vmatpush3.bf16.msra.mxu1 %v1245_v26  ;;  %v1257_v26 = vld [vmem:[%s1563_s2 + $0x18] sm:$0xff] (!%p1024_p13)  }
  0x56   : > { %1133 = vmatprep.subr.bf16.mxu0 (!%p1024_p13), %v1254_v17  ;;  %1173 = vmatprep.subr.bf16.mxu1 (!%p1024_p13), %v1254_v17 }
  0x58   : > { %1118 = vmatmul.mubr.bf16.vlgmr.msra.gmra.mrb[0].mxu0 %v1248_v27  ;;  %1126 = vmatmul.mubr.bf16.vlgmr.msra.gmra.mrb[0].mxu1 %v1249_v28 }
  0x59   : > { %1121 = vmatprep.mubr.bf16.mxu0 %v1250_v29  ;;  %1129 = vmatprep.mubr.bf16.mxu1 %v1251_v30 }
  0x5a   : > { %1134 = vmatpush3.bf16.msra.mxu0 (!%p1024_p13), %v1254_v17  ;;  %1177 = vmatpush3.bf16.msra.mxu1 (!%p1024_p13), %v1254_v17 }
  0x5b   : > { %1135 = vmatprep.subr.bf16.mxu0 (!%p1024_p13), %v1255_v18  ;;  %1174 = vmatprep.subr.bf16.mxu1 (!%p1024_p13), %v1255_v18 }
  0x5e   : > { %1136 = vmatpush3.bf16.msra.mxu0 (!%p1024_p13), %v1255_v18  ;;  %1178 = vmatpush3.bf16.msra.mxu1 (!%p1024_p13), %v1255_v18 }
  0x5f   : > { %1137 = vmatprep.subr.bf16.mxu0 (!%p1024_p13), %v1256_v19  ;;  %1175 = vmatprep.subr.bf16.mxu1 (!%p1024_p13), %v1256_v19 }
  0x60   : > { %1122 = vmatmul.mubr.bf16.gmra.mrb[4].mxu0 %v1252_v31  ;;  %1130 = vmatmul.mubr.bf16.gmra.mrb[4].mxu1 %v1253_v32 }
  0x62   : > { %1138 = vmatpush3.bf16.msra.mxu0 (!%p1024_p13), %v1256_v19  ;;  %1179 = vmatpush3.bf16.msra.mxu1 (!%p1024_p13), %v1256_v19 }
  0x63   : > { %1139 = vmatprep.subr.bf16.mxu0 (!%p1024_p13), %v1257_v26  ;;  %1176 = vmatprep.subr.bf16.mxu1 (!%p1024_p13), %v1257_v26 }
  0x66   : > { %1140 = vmatpush3.bf16.msra.mxu0 (!%p1024_p13), %v1257_v26  ;;  %1180 = vmatpush3.bf16.msra.mxu1 (!%p1024_p13), %v1257_v26 }
 0x12b   : > { %v1119_v37 = vpop.f32.mrb[0].mxu0  ;;  %v1127_v38 = vpop.f32.mrb[0].mxu1 }
 0x12c   : > { %v605_v41 = vadd.f32 %v1119_v37, %v364_v33  ;;  %v613_v42 = vadd.f32 %v1127_v38, %v372_v34  ;;  %v540_v43 = vpop.f32.mrb[1].mxu0  ;;  %v572_v44 = vpop.f32.mrb[1].mxu1 }
 0x12d   : > { %v603_v47 = vadd.f32 %v540_v43, %v362_v35  ;;  %v611_v48 = vadd.f32 %v572_v44, %v370_v36  ;;  %v1120_v49 = vpop.f32.mrb[2].mxu0  ;;  %v1128_v50 = vpop.f32.mrb[2].mxu1 }
 0x12e   : > { %622 = vst.msk [vmem:[#allocation2 + $0x10] sm:$0xff] %vm619_vm1, %v605_v41  ;;  %630 = vst.msk [vmem:[#allocation2 + $0x50] sm:$0xff] %vm619_vm1, %v613_v42  ;;  %v606_v51 = vadd.f32 %v1120_v49, %v365_v39  ;;  %v614_v52 = vadd.f32 %v1128_v50, %v373_v40  ;;  %v543_v53 = vpop.f32.mrb[3].mxu0  ;;  %v575_v54 = vpop.f32.mrb[3].mxu1 }
 0x12f   : > { %620 = vst.msk [vmem:[#allocation2] sm:$0xff] %vm619_vm1, %v603_v47  ;;  %628 = vst.msk [vmem:[#allocation2 + $0x40] sm:$0xff] %vm619_vm1, %v611_v48  ;;  %v604_v55 = vadd.f32 %v543_v53, %v363_v45  ;;  %v612_v56 = vadd.f32 %v575_v54, %v371_v46  ;;  %v1025_v45 = vld [vmem:[%s1564_s3] ss:$0 sm:$0xff] (!%p1024_p13) }
 0x130   : > { %623 = vst.msk [vmem:[#allocation2 + $0x18] sm:$0xff] %vm619_vm1, %v606_v51  ;;  %631 = vst.msk [vmem:[#allocation2 + $0x58] sm:$0xff] %vm619_vm1, %v614_v52 }
 0x131   : > { %621 = vst.msk [vmem:[#allocation2 + $0x8] sm:$0xff] %vm619_vm1, %v604_v55  ;;  %629 = vst.msk [vmem:[#allocation2 + $0x48] sm:$0xff] %vm619_vm1, %v612_v56 }
 0x133   : > { %v1123_v61 = vpop.f32.mrb[4].mxu0  ;;  %v1131_v62 = vpop.f32.mrb[4].mxu1  ;;  %639 = sbr.rel (%p1024_p13) target bundleno = 545 (0x221), region = 85 }
 0x134   : > { %v609_v1 = vadd.f32 %v1123_v61, %v368_v57  ;;  %v617_v2 = vadd.f32 %v1131_v62, %v376_v58  ;;  %v556_v3 = vpop.f32.mrb[5].mxu0  ;;  %v588_v4 = vpop.f32.mrb[5].mxu1 }
 0x135   : > { %v607_v7 = vadd.f32 %v556_v3, %v366_v59  ;;  %v615_v8 = vadd.f32 %v588_v4, %v374_v60  ;;  %v1124_v9 = vpop.f32.mrb[6].mxu0  ;;  %v1132_v10 = vpop.f32.mrb[6].mxu1  ;;  %v642_v27 = vld [vmem:[#allocation2 + $0x10] sm:$0xff] (!%p1024_p13) }
 0x136   : > { %626 = vst.msk [vmem:[#allocation2 + $0x30] sm:$0xff] %vm619_vm1, %v609_v1  ;;  %634 = vst.msk [vmem:[#allocation2 + $0x70] sm:$0xff] %vm619_vm1, %v617_v2  ;;  %v610_v11 = vadd.f32 %v1124_v9, %v369_v63  ;;  %v618_v12 = vadd.f32 %v1132_v10, %v377_v0  ;;  %v559_v13 = vpop.f32.mrb[7].mxu0  ;;  %v591_v14 = vpop.f32.mrb[7].mxu1  ;;  %v640_v20 = vld [vmem:[#allocation2] sm:$0xff] (!%p1024_p13)  ;;  %v650_v29 = vld [vmem:[#allocation2 + $0x50] sm:$0xff] (!%p1024_p13) }
 0x137   : > { %624 = vst.msk [vmem:[#allocation2 + $0x20] sm:$0xff] %vm619_vm1, %v607_v7  ;;  %632 = vst.msk [vmem:[#allocation2 + $0x60] sm:$0xff] %vm619_vm1, %v615_v8  ;;  %v608_v15 = vadd.f32 %v559_v13, %v367_v5  ;;  %v616_v16 = vadd.f32 %v591_v14, %v375_v6  ;;  %v648_v22 = vld [vmem:[#allocation2 + $0x40] sm:$0xff] (!%p1024_p13)  ;;  %v643_v28 = vld [vmem:[#allocation2 + $0x18] sm:$0xff] (!%p1024_p13) }
 0x138   : > { %627 = vst.msk [vmem:[#allocation2 + $0x38] sm:$0xff] %vm619_vm1, %v610_v11  ;;  %635 = vst.msk [vmem:[#allocation2 + $0x78] sm:$0xff] %vm619_vm1, %v618_v12  ;;  %v641_v21 = vld [vmem:[#allocation2 + $0x8] sm:$0xff] (!%p1024_p13)  ;;  %v651_v30 = vld [vmem:[#allocation2 + $0x58] sm:$0xff] (!%p1024_p13)  ;;  %v657_v35 = vpack.c.bf16 (!%p1024_p13), %v643_v28, %v642_v27 }
 0x139   : > { %625 = vst.msk [vmem:[#allocation2 + $0x28] sm:$0xff] %vm619_vm1, %v608_v15  ;;  %633 = vst.msk [vmem:[#allocation2 + $0x68] sm:$0xff] %vm619_vm1, %v616_v16  ;;  %v656_v23 = vpack.c.bf16 (!%p1024_p13), %v641_v21, %v640_v20  ;;  %v649_v24 = vld [vmem:[#allocation2 + $0x48] sm:$0xff] (!%p1024_p13)  ;;  %v661_v36 = vpack.c.bf16 (!%p1024_p13), %v651_v30, %v650_v29 }
 0x13a   : > { %v660_v25 = vpack.c.bf16 %v649_v24, %v648_v22 }
 0x13b   : > { %1141 = vmatprep.mubr.msk.bf16.mxu0 %vm619_vm1, %v656_v23 }
 0x13c   : > { %1149 = vmatprep.mubr.msk.bf16.mxu1 %vm619_vm1, %v660_v25  ;;  %1142 = vmatmul.mubr.msk.bf16.vlgmr.msra.gmra.mrb[0].mxu0 %vm619_vm1, %v657_v35 }
 0x13d   : > { %1150 = vmatmul.mubr.msk.bf16.vlgmr.msra.gmra.mrb[0].mxu1 %vm619_vm1, %v661_v36  ;;  %v646_v39 = vld [vmem:[#allocation2 + $0x30] sm:$0xff] }
 0x13e   : > { %v644_v31 = vld [vmem:[#allocation2 + $0x20] sm:$0xff]  ;;  %v654_v41 = vld [vmem:[#allocation2 + $0x70] sm:$0xff] }
 0x13f   : > { %v652_v33 = vld [vmem:[#allocation2 + $0x60] sm:$0xff]  ;;  %v647_v40 = vld [vmem:[#allocation2 + $0x38] sm:$0xff] }
 0x140   : > { %v645_v32 = vld [vmem:[#allocation2 + $0x28] sm:$0xff]  ;;  %v655_v42 = vld [vmem:[#allocation2 + $0x78] sm:$0xff]  ;;  %v659_v43 = vpack.c.bf16 %v647_v40, %v646_v39 }
 0x141   : > { %v653_v34 = vld [vmem:[#allocation2 + $0x68] sm:$0xff]  ;;  %v658_v37 = vpack.c.bf16 %v645_v32, %v644_v31  ;;  %v663_v44 = vpack.c.bf16 %v655_v42, %v654_v41 }
 0x142   : > { %v662_v38 = vpack.c.bf16 %v653_v34, %v652_v33 }
 0x143   : > { %1145 = vmatprep.mubr.msk.bf16.mxu0 %vm619_vm1, %v658_v37 }
 0x144   : > { %1153 = vmatprep.mubr.msk.bf16.mxu1 %vm619_vm1, %v662_v38  ;;  %1146 = vmatmul.mubr.msk.bf16.gmra.mrb[4].mxu0 %vm619_vm1, %v659_v43 }
 0x145   : > { %1154 = vmatmul.mubr.msk.bf16.gmra.mrb[4].mxu1 %vm619_vm1, %v663_v44 }
 0x20f   : > { %v1143_v46 = vpop.f32.mrb[0].mxu0 }
 0x210   : > { %v1151_v47 = vpop.f32.mrb[0].mxu1  ;;  %v770_v48 = vadd.f32 %v1143_v46, %v1025_v45  ;;  %v761_v50 = vpop.f32.mrb[1].mxu0 }
 0x211   : > { %v802_v49 = vadd.f32 %v1151_v47, %v1025_v45  ;;  %v793_v51 = vpop.f32.mrb[1].mxu1  ;;  %v762_v52 = vadd.f32 %v1025_v45, %v761_v50  ;;  %v1144_v54 = vpop.f32.mrb[2].mxu0 }
 0x212   : > { %v794_v53 = vadd.f32 %v1025_v45, %v793_v51  ;;  %v1152_v55 = vpop.f32.mrb[2].mxu1  ;;  %v1059_v56 = vpack.c.bf16 %v770_v48, %v770_v48  ;;  %v773_v58 = vadd.f32 %v1144_v54, %v1025_v45  ;;  %v764_v60 = vpop.f32.mrb[3].mxu0 }
 0x213   : > { %v1067_v57 = vpack.c.bf16 %v802_v49, %v802_v49  ;;  %v805_v59 = vadd.f32 %v1152_v55, %v1025_v45  ;;  %v796_v61 = vpop.f32.mrb[3].mxu1  ;;  %v1057_v62 = vpack.c.bf16 %v762_v52, %v762_v52  ;;  %v765_v0 = vadd.f32 %v1025_v45, %v764_v60 }
 0x214   : > { %v1065_v63 = vpack.c.bf16 %v794_v53, %v794_v53  ;;  %v797_v1 = vadd.f32 %v1025_v45, %v796_v61  ;;  %891 = vst.msk [vmem:[%s1431_s7 + $0x8] sm:$0xf] %vm888_vm2, %v1059_v56  ;;  %v1060_v2 = vpack.c.bf16 %v773_v58, %v773_v58 }
 0x215   : > { %899 = vst.msk [vmem:[%s1431_s7 + $0x28] sm:$0xf] %vm888_vm2, %v1067_v57  ;;  %v1068_v3 = vpack.c.bf16 %v805_v59, %v805_v59  ;;  %889 = vst.msk [vmem:[%s1431_s7] sm:$0xf] %vm888_vm2, %v1057_v62  ;;  %v1058_v4 = vpack.c.bf16 %v765_v0, %v765_v0 }
 0x216   : > { %897 = vst.msk [vmem:[%s1431_s7 + $0x20] sm:$0xf] %vm888_vm2, %v1065_v63  ;;  %v1066_v5 = vpack.c.bf16 %v797_v1, %v797_v1  ;;  %892 = vst.msk [vmem:[%s1431_s7 + $0xc] sm:$0xf] %vm888_vm2, %v1060_v2 }
 0x217   : > { %900 = vst.msk [vmem:[%s1431_s7 + $0x2c] sm:$0xf] %vm888_vm2, %v1068_v3  ;;  %890 = vst.msk [vmem:[%s1431_s7 + $0x4] sm:$0xf] %vm888_vm2, %v1058_v4  ;;  %v1147_v6 = vpop.f32.mrb[4].mxu0 }
 0x218   : > { %898 = vst.msk [vmem:[%s1431_s7 + $0x24] sm:$0xf] %vm888_vm2, %v1066_v5  ;;  %v1155_v7 = vpop.f32.mrb[4].mxu1  ;;  %v786_v8 = vadd.f32 %v1147_v6, %v1025_v45  ;;  %v777_v10 = vpop.f32.mrb[5].mxu0 }
 0x219   : > { %v818_v9 = vadd.f32 %v1155_v7, %v1025_v45  ;;  %v809_v11 = vpop.f32.mrb[5].mxu1  ;;  %v778_v12 = vadd.f32 %v1025_v45, %v777_v10  ;;  %v1148_v14 = vpop.f32.mrb[6].mxu0 }
 0x21a   : > { %v810_v13 = vadd.f32 %v1025_v45, %v809_v11  ;;  %v1156_v15 = vpop.f32.mrb[6].mxu1  ;;  %v1063_v16 = vpack.c.bf16 %v786_v8, %v786_v8  ;;  %v789_v18 = vadd.f32 %v1148_v14, %v1025_v45  ;;  %v780_v20 = vpop.f32.mrb[7].mxu0 }
 0x21b   : > { %v1071_v17 = vpack.c.bf16 %v818_v9, %v818_v9  ;;  %v821_v19 = vadd.f32 %v1156_v15, %v1025_v45  ;;  %v812_v21 = vpop.f32.mrb[7].mxu1  ;;  %v1061_v22 = vpack.c.bf16 %v778_v12, %v778_v12  ;;  %v781_v24 = vadd.f32 %v1025_v45, %v780_v20 }
 0x21c   : > { %v1069_v23 = vpack.c.bf16 %v810_v13, %v810_v13  ;;  %v813_v25 = vadd.f32 %v1025_v45, %v812_v21  ;;  %895 = vst.msk [vmem:[%s1431_s7 + $0x18] sm:$0xf] %vm888_vm2, %v1063_v16  ;;  %v1064_v26 = vpack.c.bf16 %v789_v18, %v789_v18 }
 0x21d   : > { %903 = vst.msk [vmem:[%s1431_s7 + $0x38] sm:$0xf] %vm888_vm2, %v1071_v17  ;;  %v1072_v27 = vpack.c.bf16 %v821_v19, %v821_v19  ;;  %893 = vst.msk [vmem:[%s1431_s7 + $0x10] sm:$0xf] %vm888_vm2, %v1061_v22  ;;  %v1062_v28 = vpack.c.bf16 %v781_v24, %v781_v24 }
 0x21e   : > { %901 = vst.msk [vmem:[%s1431_s7 + $0x30] sm:$0xf] %vm888_vm2, %v1069_v23  ;;  %v1070_v29 = vpack.c.bf16 %v813_v25, %v813_v25  ;;  %896 = vst.msk [vmem:[%s1431_s7 + $0x1c] sm:$0xf] %vm888_vm2, %v1064_v26 }
 0x21f   : > { %904 = vst.msk [vmem:[%s1431_s7 + $0x3c] sm:$0xf] %vm888_vm2, %v1072_v27  ;;  %894 = vst.msk [vmem:[%s1431_s7 + $0x14] sm:$0xf] %vm888_vm2, %v1062_v28 }
 0x220   : > { %902 = vst.msk [vmem:[%s1431_s7 + $0x34] sm:$0xf] %vm888_vm2, %v1070_v29 }
 0x221 PF: > { %s14_s21 = sadd.s32 1, %s1312_s21   ;;  %s1566_s15 = smov %s1292_s16 }
 0x222   : > { %p11_p0 = scmp.ge.s32.totalorder %s14_s21, 6   ;;  %s1567_s16 = smov %s1391_s28 }
 0x223   : > { %s1568_s17 = smov %s1304_s19  ;;  %s1569_s18 = smov %s1308_s20 }
 0x224   : > { %s1570_s19 = smov %s1573_s22  ;;  %s1571_s20 = smov %s1577_s23 }
 0x225   :  { %13 = sbr.rel (!%p11_p0) target bundleno = 4 (0x4), region = 123 }

// kernel: fillsimnet_forward.9
= control target key start
LH: loop header
LB: loop body
LE: loop exit
PB: predicated region body
PF: predicated region fallthrough
CT: control target
= control target key end

     0   :  { %s946_s20 = smov 0   ;;  %s1097_s0 = inlined_call_operand.vmem [shape: bf16[256,64], index: 0, kind: input, shape index: {}]   ;;  %s1098_s1 = inlined_call_operand.vmem [shape: bf16[64,64], index: 1, kind: input, shape index: {}]   ;;  %s1099_s2 = inlined_call_operand.vmem [shape: f32[1,64], index: 2, kind: input, shape index: {}]   ;;  %s1100_s3 = inlined_call_operand.vmem [shape: f32[1,64], index: 3, kind: input, shape index: {}]   ;;  %s1101_s4 = inlined_call_operand.<no memory space> [shape: f32[1,1], index: 4, kind: input, shape index: {}]   ;;  %s1102_s5 = inlined_call_operand.vmem [shape: f32[256,1], index: 5, kind: output, shape index: {}]  }
   0x1   :  { %v10_v0 = vstv %s1101_s4 }
   0x2   :  { %11 = vst [vmem:[#allocation2] sm:$0x1] %v10_v0 }
   0x3 LB: > { %s727_s21 = sadd.s32 4294967295, %s911_s20   ;;  %p731_p0 = scmp.ge.s32.totalorder %s911_s20, 1  ;;  %s911_s20 = sphi %s946_s20, %s17_s20  }
   0x4   : > { %p190_p1 = scmp.lt.s32.totalorder %s911_s20, 3 }
   0x6   : > { %p191_p2 = pnand %p731_p0, %p190_p1 }
   0x7   : > { %v829_v1 = vld [vmem:[%s1098_s1] sm:$0xff] (!%p191_p2)   ;;  %s732_s4 = sshll.u32 (!%p191_p2), %s727_s21, 4  ;;  %v830_v2 = vld [vmem:[%s1098_s1 + $0x8] sm:$0xff] (!%p191_p2)   ;;  %v831_v3 = vld [vmem:[%s1098_s1 + $0x10] sm:$0xff] (!%p191_p2)   ;;  %vm326_vm0 = vcmask (!%p191_p2), 523264   ;;  %vm654_vm1 = vcmask (!%p191_p2), 7168  }
   0x8   : > { %194 = sbr.rel (%p191_p2) target bundleno = 445 (0x1bd), region = 40  ;;  %p219_p3 = scmp.lt.s32.totalorder (!%p191_p2), %s732_s4, 31  ;;  %789 = vmatprep.subr.bf16.mxu0 (!%p191_p2), %v829_v1  ;;  %813 = vmatprep.subr.bf16.mxu1 (!%p191_p2), %v829_v1  ;;  %v832_v4 = vld [vmem:[%s1098_s1 + $0x18] sm:$0xff] (!%p191_p2)   ;;  %v983_v13 = vld [vmem:[%s1099_s2] ss:$0 sm:$0xff] (!%p191_p2) }
   0x9   : > { %790 = vmatpush3.bf16.msra.mxu0 (!%p191_p2), %v829_v1  ;;  %817 = vmatpush3.bf16.msra.mxu1 (!%p191_p2), %v829_v1  ;;  %v992_v24 = vld [vmem:[%s1100_s3] ss:$0 sm:$0xff] (!%p191_p2) }
   0xa   : > { %791 = vmatprep.subr.bf16.mxu0 (!%p191_p2), %v830_v2  ;;  %814 = vmatprep.subr.bf16.mxu1 (!%p191_p2), %v830_v2 }
   0xd   : > { %792 = vmatpush3.bf16.msra.mxu0 (!%p191_p2), %v830_v2  ;;  %818 = vmatpush3.bf16.msra.mxu1 (!%p191_p2), %v830_v2 }
   0xe   : > { %793 = vmatprep.subr.bf16.mxu0 (!%p191_p2), %v831_v3  ;;  %815 = vmatprep.subr.bf16.mxu1 (!%p191_p2), %v831_v3 }
   0xf   : > { %s1104_s4 = smov (!%p219_p3, %s732_s4), 31 }
  0x10   : > { %s733_s28 = sshll.u32 %s1104_s4, 2  ;;  %s735_s13 = sshll.u32 %s1104_s4, 3 }
  0x11   : > { %s222_s8 = scalar_lea.vmem %s1097_s0, %s733_s28  ;;  %794 = vmatpush3.bf16.msra.mxu0 %v831_v3  ;;  %819 = vmatpush3.bf16.msra.mxu1 %v831_v3  ;;  %s1058_s16 = scalar_lea.vmem %s1102_s5, %s735_s13 }
  0x12   : > { %v833_v5 = vld [vmem:[%s222_s8] sm:$0xff]   ;;  %795 = vmatprep.subr.bf16.mxu0 %v832_v4  ;;  %816 = vmatprep.subr.bf16.mxu1 %v832_v4  ;;  %v835_v7 = vld [vmem:[%s222_s8 + $0x8] sm:$0xff]   ;;  %v837_v9 = vld [vmem:[%s222_s8 + $0x10] sm:$0xff]  }
  0x13   : > { %v834_v6 = vld [vmem:[%s222_s8 + $0x20] sm:$0xff]   ;;  %797 = vmatprep.mubr.msk.bf16.mxu0 %vm326_vm0, %v833_v5  ;;  %v836_v8 = vld [vmem:[%s222_s8 + $0x28] sm:$0xff]   ;;  %v839_v10 = vld [vmem:[%s222_s8 + $0x30] sm:$0xff]  }
  0x14   : > { %805 = vmatprep.mubr.msk.bf16.mxu1 %vm326_vm0, %v834_v6  ;;  %v838_v11 = vld [vmem:[%s222_s8 + $0x18] sm:$0xff]  }
  0x15   : > { %796 = vmatpush3.bf16.msra.mxu0 %v832_v4  ;;  %820 = vmatpush3.bf16.msra.mxu1 %v832_v4  ;;  %v840_v12 = vld [vmem:[%s222_s8 + $0x38] sm:$0xff]  }
  0x18   : > { %798 = vmatmul.mubr.msk.bf16.vlgmr.msra.gmra.mrb[0].mxu0 %vm326_vm0, %v835_v7  ;;  %806 = vmatmul.mubr.msk.bf16.vlgmr.msra.gmra.mrb[0].mxu1 %vm326_vm0, %v836_v8 }
  0x19   : > { %801 = vmatprep.mubr.msk.bf16.mxu0 %vm326_vm0, %v837_v9  ;;  %809 = vmatprep.mubr.msk.bf16.mxu1 %vm326_vm0, %v839_v10 }
  0x20   : > { %802 = vmatmul.mubr.msk.bf16.gmra.mrb[4].mxu0 %vm326_vm0, %v838_v11  ;;  %810 = vmatmul.mubr.msk.bf16.gmra.mrb[4].mxu1 %vm326_vm0, %v840_v12 }
  0xeb   : > { %v799_v14 = vpop.f32.mrb[0].mxu0  ;;  %v807_v15 = vpop.f32.mrb[0].mxu1 }
  0xec   : > { %v394_v16 = vadd.f32 %v799_v14, %v983_v13  ;;  %v426_v17 = vadd.f32 %v807_v15, %v983_v13  ;;  %v385_v18 = vpop.f32.mrb[1].mxu0  ;;  %v417_v19 = vpop.f32.mrb[1].mxu1 }
  0xed   : > { %v386_v20 = vadd.f32 %v983_v13, %v385_v18  ;;  %v418_v21 = vadd.f32 %v983_v13, %v417_v19  ;;  %v800_v22 = vpop.f32.mrb[2].mxu0  ;;  %v808_v23 = vpop.f32.mrb[2].mxu1 }
  0xee   : > { %v450_v25 = vmax.f32 %v394_v16, 0.0  ;;  %v458_v26 = vmax.f32 %v426_v17, 0.0  ;;  %v397_v27 = vadd.f32 %v800_v22, %v983_v13  ;;  %v429_v28 = vadd.f32 %v808_v23, %v983_v13  ;;  %v388_v29 = vpop.f32.mrb[3].mxu0  ;;  %v420_v30 = vpop.f32.mrb[3].mxu1 }
  0xef   : > { %v448_v31 = vmax.f32 %v386_v20, 0.0  ;;  %v456_v35 = vmax.f32 %v418_v21, 0.0  ;;  %v389_v37 = vadd.f32 %v983_v13, %v388_v29  ;;  %v421_v38 = vadd.f32 %v983_v13, %v420_v30 }
  0xf0   : > { %v451_v32 = vmax.f32 %v397_v27, 0.0  ;;  %v481_v33 = vmul.f32 %v992_v24, %v458_v26  ;;  %v473_v34 = vmul.f32 %v992_v24, %v450_v25  ;;  %v459_v36 = vmax.f32 %v429_v28, 0.0 }
  0xf1   : > { %v471_v42 = vmul.f32 %v992_v24, %v448_v31  ;;  %v449_v47 = vmax.f32 %v389_v37, 0.0  ;;  %v457_v48 = vmax.f32 %v421_v38, 0.0  ;;  %v479_v51 = vmul.f32 %v992_v24, %v456_v35 }
  0xf2   : > { %v517_v39 = vsel %vm326_vm0, %v481_v33, 0.0  ;;  %v493_v40 = vsel %vm326_vm0, %v473_v34, 0.0  ;;  %v474_v41 = vmul.f32 %v992_v24, %v451_v32  ;;  %v482_v50 = vmul.f32 %v992_v24, %v459_v36  ;;  %v1038_v32 = vld [vmem:[#allocation2] ss:$0 sm:$0xff] }
  0xf3   : > { %518 = vadd.xlane.f32.xlu0 %v517_v39  ;;  %494 = vadd.xlane.f32.xlu1 %v493_v40  ;;  %v803_v43 = vpop.f32.mrb[4].mxu0  ;;  %v811_v44 = vpop.f32.mrb[4].mxu1  ;;  %v487_v55 = vsel %vm326_vm0, %v471_v42, 0.0  ;;  %v511_v60 = vsel %vm326_vm0, %v479_v51, 0.0  ;;  %v480_v61 = vmul.f32 %v992_v24, %v457_v48  ;;  %v472_v62 = vmul.f32 %v992_v24, %v449_v47 }
  0xf4   : > { %v401_v45 = vpop.f32.mrb[5].mxu0  ;;  %v433_v46 = vpop.f32.mrb[5].mxu1  ;;  %v410_v53 = vadd.f32 %v803_v43, %v983_v13  ;;  %v496_v54 = vsel %vm326_vm0, %v474_v41, 0.0  ;;  %v520_v59 = vsel %vm326_vm0, %v482_v50, 0.0  ;;  %v442_v11 = vadd.f32 %v811_v44, %v983_v13 }
  0xf5   : > { %v804_v49 = vpop.f32.mrb[6].mxu0  ;;  %v812_v52 = vpop.f32.mrb[6].mxu1  ;;  %v402_v0 = vadd.f32 %v983_v13, %v401_v45  ;;  %v434_v3 = vadd.f32 %v983_v13, %v433_v46  ;;  %v514_v4 = vsel %vm326_vm0, %v480_v61, 0.0  ;;  %v490_v5 = vsel %vm326_vm0, %v472_v62, 0.0 }
  0xf6   : > { %v413_v56 = vadd.f32 %v804_v49, %v983_v13  ;;  %v404_v57 = vpop.f32.mrb[7].mxu0  ;;  %v436_v58 = vpop.f32.mrb[7].mxu1  ;;  %v454_v63 = vmax.f32 %v410_v53, 0.0  ;;  %v445_v14 = vadd.f32 %v812_v52, %v983_v13  ;;  %v462_v20 = vmax.f32 %v442_v11, 0.0 }
  0xf7   : > { %497 = vadd.xlane.f32.xlu1 %v496_v54  ;;  %488 = vadd.xlane.f32.xlu0 %v487_v55  ;;  %v405_v2 = vadd.f32 %v983_v13, %v404_v57  ;;  %v437_v6 = vadd.f32 %v983_v13, %v436_v58  ;;  %v452_v7 = vmax.f32 %v402_v0, 0.0  ;;  %v460_v12 = vmax.f32 %v434_v3, 0.0 }
  0xf8   : > { %v455_v1 = vmax.f32 %v413_v56, 0.0  ;;  %v477_v10 = vmul.f32 %v992_v24, %v454_v63  ;;  %v463_v21 = vmax.f32 %v445_v14, 0.0  ;;  %v485_v29 = vmul.f32 %v992_v24, %v462_v20 }
  0xf9   : > { %v453_v8 = vmax.f32 %v405_v2, 0.0  ;;  %v461_v15 = vmax.f32 %v437_v6, 0.0  ;;  %v475_v19 = vmul.f32 %v992_v24, %v452_v7  ;;  %v483_v13 = vmul.f32 %v992_v24, %v460_v12 }
  0xfa   : > { %v478_v9 = vmul.f32 %v992_v24, %v455_v1  ;;  %v505_v17 = vsel %vm326_vm0, %v477_v10, 0.0  ;;  %v486_v28 = vmul.f32 %v992_v24, %v463_v21  ;;  %v529_v31 = vsel %vm326_vm0, %v485_v29, 0.0 }
  0xfb   : > { %521 = vadd.xlane.f32.xlu1 %v520_v59  ;;  %512 = vadd.xlane.f32.xlu0 %v511_v60  ;;  %v476_v18 = vmul.f32 %v992_v24, %v453_v8  ;;  %v499_v23 = vsel %vm326_vm0, %v475_v19, 0.0  ;;  %v484_v25 = vmul.f32 %v992_v24, %v461_v15  ;;  %v523_v27 = vsel %vm326_vm0, %v483_v13, 0.0 }
  0xfc   : > { %v508_v16 = vsel %vm326_vm0, %v478_v9, 0.0  ;;  %v532_v30 = vsel %vm326_vm0, %v486_v28, 0.0 }
  0xfd   : > { %v502_v22 = vsel %vm326_vm0, %v476_v18, 0.0  ;;  %v526_v26 = vsel %vm326_vm0, %v484_v25, 0.0 }
  0xff   : > { %515 = vadd.xlane.f32.xlu1 %v514_v4  ;;  %491 = vadd.xlane.f32.xlu0 %v490_v5 }
 0x103   : > { %509 = vadd.xlane.f32.xlu1 %v508_v16  ;;  %506 = vadd.xlane.f32.xlu0 %v505_v17 }
 0x107   : > { %503 = vadd.xlane.f32.xlu1 %v502_v22  ;;  %500 = vadd.xlane.f32.xlu0 %v499_v23 }
 0x10b   : > { %527 = vadd.xlane.f32.xlu1 %v526_v26  ;;  %524 = vadd.xlane.f32.xlu0 %v523_v27 }
 0x10f   : > { %533 = vadd.xlane.f32.xlu1 %v532_v30  ;;  %530 = vadd.xlane.f32.xlu0 %v529_v31 }
 0x180   : > { %v519_v33 = vpop.xlane.xlu0 %518  ;;  %v495_v34 = vpop.xlane.xlu1 %494 }
 0x181   : > { %v552_v35 = vadd.f32 %v1038_v32, %v519_v33  ;;  %v544_v36 = vadd.f32 %v1038_v32, %v495_v34 }
 0x183   : > { %v769_v37 = vmul.f32 -1.442695, %v552_v35  ;;  %v761_v38 = vmul.f32 -1.442695, %v544_v36 }
 0x184   : > { %v498_v39 = vpop.xlane.xlu1 %497  ;;  %v489_v24 = vpop.xlane.xlu0 %488 }
 0x185   : > { %841 = vpow2.f32 %v769_v37  ;;  %v545_v40 = vadd.f32 %v1038_v32, %v498_v39  ;;  %v542_v41 = vadd.f32 %v1038_v32, %v489_v24 }
 0x186   : > { %843 = vpow2.f32 %v761_v38 }
 0x187   : > { %v762_v42 = vmul.f32 -1.442695, %v545_v40  ;;  %v759_v43 = vmul.f32 -1.442695, %v542_v41 }
 0x188   : > { %v522_v44 = vpop.xlane.xlu1 %521  ;;  %v513_v45 = vpop.xlane.xlu0 %512 }
 0x189   : > { %845 = vpow2.f32 %v762_v42  ;;  %v553_v46 = vadd.f32 %v1038_v32, %v522_v44  ;;  %v550_v47 = vadd.f32 %v1038_v32, %v513_v45 }
 0x18a   : > { %847 = vpow2.f32 %v759_v43 }
 0x18b   : > { %v770_v48 = vmul.f32 -1.442695, %v553_v46  ;;  %v767_v49 = vmul.f32 -1.442695, %v550_v47 }
 0x18c   : > { %v516_v50 = vpop.xlane.xlu1 %515  ;;  %v492_v51 = vpop.xlane.xlu0 %491 }
 0x18d   : > { %849 = vpow2.f32 %v770_v48  ;;  %v551_v52 = vadd.f32 %v1038_v32, %v516_v50  ;;  %v543_v53 = vadd.f32 %v1038_v32, %v492_v51 }
 0x18e   : > { %851 = vpow2.f32 %v767_v49 }
 0x18f   : > { %v842_v54 = vpop.eup %841  ;;  %v768_v55 = vmul.f32 -1.442695, %v551_v52  ;;  %v760_v58 = vmul.f32 -1.442695, %v543_v53 }
 0x190   : > { %v844_v56 = vpop.eup %843  ;;  %v616_v57 = vadd.f32 1.0, %v842_v54  ;;  %v510_v59 = vpop.xlane.xlu1 %509 }
 0x191   : > { %v507_v60 = vpop.xlane.xlu0 %506  ;;  %v608_v61 = vadd.f32 1.0, %v844_v56  ;;  %853 = vpow2.f32 %v768_v55  ;;  %v549_v62 = vadd.f32 %v1038_v32, %v510_v59 }
 0x192   : > { %v548_v63 = vadd.f32 %v1038_v32, %v507_v60  ;;  %855 = vrcp.f32 %v616_v57 }
 0x193   : > { %v846_v0 = vpop.eup %845  ;;  %857 = vrcp.f32 %v608_v61  ;;  %v766_v1 = vmul.f32 -1.442695, %v549_v62 }
 0x194   : > { %v848_v2 = vpop.eup %847  ;;  %v609_v3 = vadd.f32 1.0, %v846_v0  ;;  %859 = vpow2.f32 %v760_v58  ;;  %v765_v4 = vmul.f32 -1.442695, %v548_v63  ;;  %v504_v5 = vpop.xlane.xlu1 %503 }
 0x195   : > { %v501_v6 = vpop.xlane.xlu0 %500  ;;  %v606_v7 = vadd.f32 1.0, %v848_v2  ;;  %861 = vpow2.f32 %v766_v1  ;;  %v547_v8 = vadd.f32 %v1038_v32, %v504_v5 }
 0x196   : > { %v546_v9 = vadd.f32 %v1038_v32, %v501_v6  ;;  %863 = vrcp.f32 %v609_v3 }
 0x197   : > { %v850_v10 = vpop.eup %849  ;;  %865 = vrcp.f32 %v606_v7  ;;  %v764_v11 = vmul.f32 -1.442695, %v547_v8 }
 0x198   : > { %v852_v12 = vpop.eup %851  ;;  %v617_v14 = vadd.f32 1.0, %v850_v10  ;;  %867 = vpow2.f32 %v765_v4  ;;  %v763_v15 = vmul.f32 -1.442695, %v546_v9  ;;  %v528_v16 = vpop.xlane.xlu1 %527 }
 0x199   : > { %v525_v17 = vpop.xlane.xlu0 %524  ;;  %v614_v18 = vadd.f32 1.0, %v852_v12  ;;  %869 = vpow2.f32 %v764_v11  ;;  %v555_v19 = vadd.f32 %v1038_v32, %v528_v16 }
 0x19a   : > { %v554_v20 = vadd.f32 %v1038_v32, %v525_v17  ;;  %871 = vrcp.f32 %v617_v14 }
 0x19b   : > { %v854_v21 = vpop.eup %853  ;;  %873 = vrcp.f32 %v614_v18  ;;  %v772_v22 = vmul.f32 -1.442695, %v555_v19 }
 0x19c   : > { %v771_v23 = vmul.f32 -1.442695, %v554_v20  ;;  %v856_v25 = vpop.eup %855  ;;  %v615_v13 = vadd.f32 1.0, %v854_v21  ;;  %875 = vpow2.f32 %v763_v15  ;;  %v534_v26 = vpop.xlane.xlu1 %533 }
 0x19d   : > { %v531_v27 = vpop.xlane.xlu0 %530  ;;  %v858_v28 = vpop.eup %857  ;;  %665 = vst.msk [vmem:[%s1058_s16 + $0x50] sm:$0xff] %vm654_vm1, %v856_v25  ;;  %877 = vpow2.f32 %v772_v22  ;;  %v557_v29 = vadd.f32 %v1038_v32, %v534_v26 }
 0x19e   : > { %v556_v30 = vadd.f32 %v1038_v32, %v531_v27  ;;  %v860_v31 = vpop.eup %859  ;;  %657 = vst.msk [vmem:[%s1058_s16 + $0x10] sm:$0xff] %vm654_vm1, %v858_v28  ;;  %879 = vrcp.f32 %v615_v13 }
 0x19f   : > { %v862_v33 = vpop.eup %861  ;;  %v607_v34 = vadd.f32 1.0, %v860_v31  ;;  %881 = vpow2.f32 %v771_v23  ;;  %v774_v35 = vmul.f32 -1.442695, %v557_v29 }
 0x1a0   : > { %v864_v36 = vpop.eup %863  ;;  %v613_v37 = vadd.f32 1.0, %v862_v33  ;;  %v773_v38 = vmul.f32 -1.442695, %v556_v30 }
 0x1a1   : > { %v866_v39 = vpop.eup %865  ;;  %658 = vst.msk [vmem:[%s1058_s16 + $0x18] sm:$0xff] %vm654_vm1, %v864_v36  ;;  %883 = vrcp.f32 %v607_v34 }
 0x1a2   : > { %v868_v24 = vpop.eup %867  ;;  %655 = vst.msk [vmem:[%s1058_s16] sm:$0xff] %vm654_vm1, %v866_v39  ;;  %885 = vrcp.f32 %v613_v37 }
 0x1a3   : > { %v870_v32 = vpop.eup %869  ;;  %v612_v40 = vadd.f32 1.0, %v868_v24  ;;  %887 = vpow2.f32 %v774_v35 }
 0x1a4   : > { %v872_v41 = vpop.eup %871  ;;  %v611_v42 = vadd.f32 1.0, %v870_v32  ;;  %889 = vpow2.f32 %v773_v38 }
 0x1a5   : > { %v874_v43 = vpop.eup %873  ;;  %666 = vst.msk [vmem:[%s1058_s16 + $0x58] sm:$0xff] %vm654_vm1, %v872_v41  ;;  %891 = vrcp.f32 %v612_v40 }
 0x1a6   : > { %v876_v44 = vpop.eup %875  ;;  %663 = vst.msk [vmem:[%s1058_s16 + $0x40] sm:$0xff] %vm654_vm1, %v874_v43  ;;  %893 = vrcp.f32 %v611_v42 }
 0x1a7   : > { %v878_v45 = vpop.eup %877  ;;  %v610_v46 = vadd.f32 1.0, %v876_v44 }
 0x1a8   : > { %v880_v47 = vpop.eup %879  ;;  %v619_v48 = vadd.f32 1.0, %v878_v45 }
 0x1a9   : > { %v882_v49 = vpop.eup %881  ;;  %664 = vst.msk [vmem:[%s1058_s16 + $0x48] sm:$0xff] %vm654_vm1, %v880_v47  ;;  %895 = vrcp.f32 %v610_v46 }
 0x1aa   : > { %897 = vrcp.f32 %v619_v48  ;;  %v618_v50 = vadd.f32 1.0, %v882_v49 }
 0x1ab   : > { %v884_v51 = vpop.eup %883 }
 0x1ac   : > { %v886_v52 = vpop.eup %885  ;;  %656 = vst.msk [vmem:[%s1058_s16 + $0x8] sm:$0xff] %vm654_vm1, %v884_v51  ;;  %899 = vrcp.f32 %v618_v50 }
 0x1ad   : > { %v888_v53 = vpop.eup %887  ;;  %662 = vst.msk [vmem:[%s1058_s16 + $0x38] sm:$0xff] %vm654_vm1, %v886_v52 }
 0x1ae   : > { %v890_v54 = vpop.eup %889  ;;  %v621_v55 = vadd.f32 1.0, %v888_v53 }
 0x1af   : > { %v892_v56 = vpop.eup %891  ;;  %v620_v57 = vadd.f32 1.0, %v890_v54 }
 0x1b0   : > { %v894_v58 = vpop.eup %893  ;;  %661 = vst.msk [vmem:[%s1058_s16 + $0x30] sm:$0xff] %vm654_vm1, %v892_v56  ;;  %901 = vrcp.f32 %v621_v55 }
 0x1b1   : > { %660 = vst.msk [vmem:[%s1058_s16 + $0x28] sm:$0xff] %vm654_vm1, %v894_v58  ;;  %903 = vrcp.f32 %v620_v57 }
 0x1b3   : > { %v896_v59 = vpop.eup %895 }
 0x1b4   : > { %v898_v60 = vpop.eup %897  ;;  %659 = vst.msk [vmem:[%s1058_s16 + $0x20] sm:$0xff] %vm654_vm1, %v896_v59 }
 0x1b5   : > { %668 = vst.msk [vmem:[%s1058_s16 + $0x68] sm:$0xff] %vm654_vm1, %v898_v60 }
 0x1b6   : > { %v900_v61 = vpop.eup %899 }
 0x1b7   : > { %667 = vst.msk [vmem:[%s1058_s16 + $0x60] sm:$0xff] %vm654_vm1, %v900_v61 }
 0x1ba   : > { %v902_v62 = vpop.eup %901 }
 0x1bb   : > { %v904_v63 = vpop.eup %903  ;;  %670 = vst.msk [vmem:[%s1058_s16 + $0x78] sm:$0xff] %vm654_vm1, %v902_v62 }
 0x1bc   : > { %669 = vst.msk [vmem:[%s1058_s16 + $0x70] sm:$0xff] %vm654_vm1, %v904_v63 }
 0x1bd PF: > { %s17_s20 = sadd.s32 1, %s911_s20  }
 0x1be   : > { %p14_p4 = scmp.ge.s32.totalorder %s17_s20, 4  }
 0x1c0   :  { %16 = sbr.rel (!%p14_p4) target bundleno = 3 (0x3), region = 70 }

</bundles_post_ra>
